<compile_context>
chip_gen: v7x
topology: tpu7x:2x2x1
jax: 0.10.0
libtpu: 0.0.40
codegen_flags: <defaults>
</compile_context>

<pallas_src>
import jax
import jax.numpy as jnp
from jax import lax
from jax.experimental import pallas as pl
from jax.experimental.pallas import tpu as pltpu


def _round_up(x, m):
    return ((x + m - 1) // m) * m


# ----------------------------- Pallas kernel ------------------------------ #

def _make_fused_doubleconv_kernel(N, Ccat, Cmid, Cout, H, W, HWL, Lp):
    """Fused DoubleConv kernel: (conv3x3 -> folded-BN -> ReLU) twice, whole
    batch in one invocation.

    Ref layout (channels-first, flattened zero-padded spatial, f32):
      xp_ref : (N, Ccat, Lp)      per-image padded input, lane-padded to Lp
      w1_ref : (Cmid, 9*Ccat)     conv1 taps stacked along K, BN1 scale folded
      b1_ref : (Cmid, 1)          folded BN1 bias
      w2_ref : (Cout, 9*Cmid)     conv2 taps stacked along K, BN2 scale folded
      b2_ref : (Cout, 1)          folded BN2 bias
      msk_ref: (1, N*HWL)         1.0 on valid flat columns, 0.0 on junk
      o_ref  : (N*Cout, HWL)      sublane+lane dense output slab
      p2_ref : VMEM (Cmid, N*Lp)  scratch: zero-padded conv1 output

    "Full-width" trick: for tap (dy,dx) the contiguous flat slice
    xp[:, dy*Wp+dx : dy*Wp+dx + HWL] equals the (y+dy, x+dx) shifted window
    for every valid output pixel; wrap/tail columns are junk and masked off.
    """
    Wp = W + 2
    HWp = H * Wp

    def kernel(xp_ref, w1_ref, b1_ref, w2_ref, b2_ref, msk_ref, o_ref, p2_ref):
        mask = msk_ref[...]                                   # (1, N*HWL)

        # ---- conv1: one K = 9*Ccat matmul over all N*HWL lanes ----
        per_img = []
        for n in range(N):
            img = xp_ref[n]                                   # (Ccat, Lp)
            taps = [img[:, dy * Wp + dx: dy * Wp + dx + HWL]
                    for dy in range(3) for dx in range(3)]
            per_img.append(jnp.concatenate(taps, axis=0))     # (9*Ccat, HWL)
        rhs1 = per_img[0] if N == 1 else jnp.concatenate(per_img, axis=1)
        y1 = jnp.dot(w1_ref[...], rhs1,
                     preferred_element_type=jnp.float32)      # (Cmid, N*HWL)
        y1 = jnp.maximum(y1 + b1_ref[...], 0.0) * mask        # zero junk cols

        # ---- re-pad intermediate into a pre-zeroed VMEM scratch ----
        # Valid pixel (y, x) moves from flat y*Wp + x to (y+1)*Wp + (x+1),
        # i.e. a lane shift of Wp+1; masked junk columns land exactly on the
        # zero-padding positions, so the scratch holds the exact padded map.
        p2_ref[...] = jnp.zeros((Cmid, N * Lp), jnp.float32)
        for n in range(N):
            p2_ref[:, n * Lp + Wp + 1: n * Lp + Wp + 1 + HWL] = (
                y1[:, n * HWL:(n + 1) * HWL])
        p2 = p2_ref[...]                                      # (Cmid, N*Lp)

        # ---- conv2: one K = 9*Cmid matmul ----
        per_img2 = []
        for n in range(N):
            base = n * Lp
            taps = [p2[:, base + dy * Wp + dx: base + dy * Wp + dx + HWL]
                    for dy in range(3) for dx in range(3)]
            per_img2.append(jnp.concatenate(taps, axis=0))    # (9*Cmid, HWL)
        rhs2 = per_img2[0] if N == 1 else jnp.concatenate(per_img2, axis=1)
        y2 = jnp.dot(w2_ref[...], rhs2,
                     preferred_element_type=jnp.float32)      # (Cout, N*HWL)
        y2 = jnp.maximum(y2 + b2_ref[...], 0.0)

        # ---- sublane- and lane-dense output store: (N*Cout, HWL) ----
        if N == 1:
            o_ref[...] = y2
        else:
            o_ref[...] = jnp.concatenate(
                [y2[:, n * HWL:(n + 1) * HWL] for n in range(N)], axis=0)

    return kernel


def _double_conv_pallas(x, w1, s1, b1, w2, s2, b2):
    """Fused DoubleConv as a single-step pallas_call.

    x  : (N, Ccat, H, W) float32
    w1 : (Cmid, Ccat, 3, 3)  PyTorch OIHW;  s1/b1 = folded BN1 scale/bias
    w2 : (Cout, Cmid, 3, 3)                 s2/b2 = folded BN2 scale/bias
    returns (N, Cout, H, W)
    """
    N, Ccat, H, W = x.shape
    Hp, Wp = H + 2, W + 2
    HWp = H * Wp                                   # valid flat width / image
    HWL = _round_up(HWp, 128)                      # lane-dense flat width
    Lp = _round_up(max(Hp * Wp, 2 * Wp + 2 + HWL), 128)   # padded input length
    c_mid = w1.shape[0]
    c_out = w2.shape[0]

    # Zero-pad spatially, flatten spatial, zero-pad the flat tail to Lp lanes.
    xp = jnp.pad(x, ((0, 0), (0, 0), (1, 1), (1, 1))).reshape(N, Ccat, Hp * Wp)
    xp = jnp.pad(xp, ((0, 0), (0, 0), (0, Lp - Hp * Wp))).astype(jnp.float32)

    # Tap-stacked, BN-scale-folded weights: w1s[o, t*Ccat + c] = w1[o,c,dy,dx]*s1[o]
    w1t = (jnp.transpose(w1, (2, 3, 0, 1)).reshape(9, c_mid, Ccat)
           * s1[None, :, None])
    w1s = jnp.transpose(w1t, (1, 0, 2)).reshape(c_mid, 9 * Ccat).astype(jnp.float32)
    w2t = (jnp.transpose(w2, (2, 3, 0, 1)).reshape(9, c_out, c_mid)
           * s2[None, :, None])
    w2s = jnp.transpose(w2t, (1, 0, 2)).reshape(c_out, 9 * c_mid).astype(jnp.float32)
    b1c = b1.reshape(c_mid, 1).astype(jnp.float32)
    b2c = b2.reshape(c_out, 1).astype(jnp.float32)

    # 1.0 on valid columns (row < H and x < W) of the lane-padded flat layout.
    cols = jnp.arange(HWL)
    mask1 = (((cols % Wp) < W) & (cols < HWp)).astype(jnp.float32)
    mask = jnp.tile(mask1, (N,)).reshape(1, N * HWL)

    kernel = _make_fused_doubleconv_kernel(N, Ccat, c_mid, c_out, H, W, HWL, Lp)

    flops = 2 * N * H * W * 9 * (c_mid * Ccat + c_out * c_mid)
    bytes_accessed = 4 * (xp.size + N * c_out * HWL + w1s.size + w2s.size
                          + b1c.size + b2c.size + mask.size)

    out = pl.pallas_call(
        kernel,
        out_shape=jax.ShapeDtypeStruct((N * c_out, HWL), jnp.float32),
        grid_spec=pltpu.PrefetchScalarGridSpec(
            num_scalar_prefetch=0,
            grid=(1,),                               # whole batch in one step
            in_specs=[
                pl.BlockSpec((N, Ccat, Lp), lambda i: (0, 0, 0)),
                pl.BlockSpec((c_mid, 9 * Ccat), lambda i: (0, 0)),
                pl.BlockSpec((c_mid, 1), lambda i: (0, 0)),
                pl.BlockSpec((c_out, 9 * c_mid), lambda i: (0, 0)),
                pl.BlockSpec((c_out, 1), lambda i: (0, 0)),
                pl.BlockSpec((1, N * HWL), lambda i: (0, 0)),
            ],
            out_specs=pl.BlockSpec((N * c_out, HWL), lambda i: (0, 0)),
            scratch_shapes=[pltpu.VMEM((c_mid, N * Lp), jnp.float32)],
        ),
        compiler_params=pltpu.CompilerParams(
            dimension_semantics=("arbitrary",)),
        cost_estimate=pl.CostEstimate(flops=flops, transcendentals=0,
                                      bytes_accessed=bytes_accessed),
    )(xp, w1s, b1c, w2s, b2c, mask)

    # (N*Cout, HWL) -> drop lane/wrap junk -> (N, Cout, H, W)
    out = out.reshape(N, c_out, HWL)[:, :, :HWp]
    return out.reshape(N, c_out, H, Wp)[:, :, :, :W]


# ------------------------------ JAX glue ops ------------------------------ #
# TODO(synk): these HBM-level ops (upsample / diff-pad / channel concat /
# zero-pad) are the remaining wrapper glue flagged by the perf review; fusing
# them into the kernel needs in-kernel scratch construction of the padded
# flat layout and is left for a follow-up.

def _interp_matrix(out_size, in_size):
    """Row-stochastic 1-D bilinear (align_corners=True) interpolation matrix."""
    if in_size == 1:
        return jnp.ones((out_size, 1), jnp.float32)
    pos = jnp.arange(out_size, dtype=jnp.float32) * (in_size - 1) / (out_size - 1)
    lo = jnp.floor(pos).astype(jnp.int32)
    hi = jnp.minimum(lo + 1, in_size - 1)
    w = pos - lo.astype(jnp.float32)
    return (jax.nn.one_hot(lo, in_size, dtype=jnp.float32) * (1.0 - w)[:, None]
            + jax.nn.one_hot(hi, in_size, dtype=jnp.float32) * w[:, None])


def _bilinear_up2_separable(x):
    """nn.Upsample(scale_factor=2, mode='bilinear', align_corners=True), NCHW,
    as two tiny separable matmuls (no fancy-index gathers)."""
    N, C, H, W = x.shape
    UH = _interp_matrix(2 * H, H)
    UW = _interp_matrix(2 * W, W)
    return jnp.einsum('oh,nchw,pw->ncop', UH, x, UW)


def _fold_bn(gamma, beta, mean, var, eps=1e-5):
    scale = gamma / jnp.sqrt(var + eps)
    bias = beta - mean * scale
    return scale, bias


def up_forward(x1, x2, params):
    """Forward of `Up` (bilinear=True). x1, x2 in NCHW (PyTorch layout)."""
    x1u = _bilinear_up2_separable(x1)
    diffY = x2.shape[2] - x1u.shape[2]
    diffX = x2.shape[3] - x1u.shape[3]
    x1u = jnp.pad(x1u, ((0, 0), (0, 0),
                        (diffY // 2, diffY - diffY // 2),
                        (diffX // 2, diffX - diffX // 2)))
    x = jnp.concatenate([x2, x1u], axis=1)

    s1, b1 = _fold_bn(params["g1"], params["be1"], params["m1"], params["v1"])
    s2, b2 = _fold_bn(params["g2"], params["be2"], params["m2"], params["v2"])
    return _double_conv_pallas(x, params["w1"], s1, b1, params["w2"], s2, b2)


# --------------------------- pure-JAX reference ---------------------------- #

def _bilinear_up2_ref(x):
    """Reference (gather-based) align_corners=True 2x bilinear upsample, NCHW."""
    N, C, H, W = x.shape
    Ho, Wo = 2 * H, 2 * W
    ys = jnp.arange(Ho, dtype=jnp.float32) * (H - 1) / (Ho - 1)
    xs = jnp.arange(Wo, dtype=jnp.float32) * (W - 1) / (Wo - 1)
    y0 = jnp.floor(ys).astype(jnp.int32)
    x0 = jnp.floor(xs).astype(jnp.int32)
    y1i = jnp.minimum(y0 + 1, H - 1)
    x1i = jnp.minimum(x0 + 1, W - 1)
    wy = (ys - y0.astype(jnp.float32))[None, None, :, None]
    wx = (xs - x0.astype(jnp.float32))[None, None, None, :]
    g00 = x[:, :, y0][:, :, :, x0]
    g01 = x[:, :, y0][:, :, :, x1i]
    g10 = x[:, :, y1i][:, :, :, x0]
    g11 = x[:, :, y1i][:, :, :, x1i]
    top = g00 * (1.0 - wx) + g01 * wx
    bot = g10 * (1.0 - wx) + g11 * wx
    return top * (1.0 - wy) + bot * wy


def _conv3x3_ref(x, w_oihw):
    return lax.conv_general_dilated(
        x, w_oihw, window_strides=(1, 1), padding="SAME",
        dimension_numbers=("NCHW", "OIHW", "NCHW"))


def up_forward_ref(x1, x2, params):
    x1u = _bilinear_up2_ref(x1)
    diffY = x2.shape[2] - x1u.shape[2]
    diffX = x2.shape[3] - x1u.shape[3]
    x1u = jnp.pad(x1u, ((0, 0), (0, 0),
                        (diffY // 2, diffY - diffY // 2),
                        (diffX // 2, diffX - diffX // 2)))
    x = jnp.concatenate([x2, x1u], axis=1)
    s1, b1 = _fold_bn(params["g1"], params["be1"], params["m1"], params["v1"])
    s2, b2 = _fold_bn(params["g2"], params["be2"], params["m2"], params["v2"])
    y = jnp.maximum(_conv3x3_ref(x, params["w1"])
                    * s1[None, :, None, None] + b1[None, :, None, None], 0.0)
    y = jnp.maximum(_conv3x3_ref(y, params["w2"])
                    * s2[None, :, None, None] + b2[None, :, None, None], 0.0)
    return y


# --------------------------------- main ------------------------------------ #

if __name__ == "__main__":
    # Up(in_channels=8, out_channels=4, bilinear=True)
    in_channels, out_channels = 8, 4
    mid_channels = in_channels                      # DoubleConv(mid=in_channels)
    cat_channels = in_channels + out_channels       # 12

    key = jax.random.PRNGKey(0)
    k = jax.random.split(key, 12)

    # Inputs (NCHW): x1 deeper-layer features (to be upsampled), x2 skip connection.
    x1 = jax.random.normal(k[0], (2, in_channels, 8, 8), jnp.float32)
    x2 = jax.random.normal(k[1], (2, out_channels, 16, 16), jnp.float32)

    params = {
        # conv1: Conv2d(cat_channels -> mid_channels, 3x3, bias=False), OIHW
        "w1": 0.1 * jax.random.normal(k[2], (mid_channels, cat_channels, 3, 3), jnp.float32),
        "g1": 1.0 + 0.1 * jax.random.normal(k[3], (mid_channels,), jnp.float32),
        "be1": 0.1 * jax.random.normal(k[4], (mid_channels,), jnp.float32),
        "m1": 0.1 * jax.random.normal(k[5], (mid_channels,), jnp.float32),
        "v1": 0.5 + 0.1 * jnp.abs(jax.random.normal(k[6], (mid_channels,), jnp.float32)),
        # conv2: Conv2d(mid_channels -> out_channels, 3x3, bias=False), OIHW
        "w2": 0.1 * jax.random.normal(k[7], (out_channels, mid_channels, 3, 3), jnp.float32),
        "g2": 1.0 + 0.1 * jax.random.normal(k[8], (out_channels,), jnp.float32),
        "be2": 0.1 * jax.random.normal(k[9], (out_channels,), jnp.float32),
        "m2": 0.1 * jax.random.normal(k[10], (out_channels,), jnp.float32),
        "v2": 0.5 + 0.1 * jnp.abs(jax.random.normal(k[11], (out_channels,), jnp.float32)),
    }

    up_forward_jit = jax.jit(up_forward)

    out = jax.block_until_ready(up_forward_jit(x1, x2, params))
    ref = jax.block_until_ready(up_forward_ref(x1, x2, params))

    assert out.shape == (2, out_channels, 16, 16), out.shape
    assert jnp.allclose(out, ref, atol=1e-4, rtol=1e-4), "mismatch vs pure-JAX reference"

    print("KERNEL_OK")
</pallas_src>

<mosaic_0001>
module attributes {stable_mosaic.version = 11 : i64} {
  func.func @kernel(%arg0: i32, %arg1: memref<2x12x512xf32, #tpu.memory_space<vmem>>, %arg2: memref<8x108xf32, #tpu.memory_space<vmem>>, %arg3: memref<8x1xf32, #tpu.memory_space<vmem>>, %arg4: memref<4x72xf32, #tpu.memory_space<vmem>>, %arg5: memref<4x1xf32, #tpu.memory_space<vmem>>, %arg6: memref<1x768xf32, #tpu.memory_space<vmem>>, %arg7: memref<8x384xf32, #tpu.memory_space<vmem>>, %arg8: memref<8x1024xf32, #tpu.memory_space<vmem>>) attributes {dimension_semantics = [#tpu.dimension_semantics<arbitrary>], iteration_bounds = array<i64: 1>, scalar_prefetch = 0 : i64, scratch_operands = 1 : i64, tpu.core_type = #tpu.core_type<tc>, window_params = [{pipeline_mode = #tpu.pipeline_mode<synchronous>, transform_indices = @transform_0, window_bounds = array<i64: 2, 12, 512>}, {pipeline_mode = #tpu.pipeline_mode<synchronous>, transform_indices = @transform_1, window_bounds = array<i64: 8, 108>}, {pipeline_mode = #tpu.pipeline_mode<synchronous>, transform_indices = @transform_2, window_bounds = array<i64: 8, 1>}, {pipeline_mode = #tpu.pipeline_mode<synchronous>, transform_indices = @transform_3, window_bounds = array<i64: 4, 72>}, {pipeline_mode = #tpu.pipeline_mode<synchronous>, transform_indices = @transform_4, window_bounds = array<i64: 4, 1>}, {pipeline_mode = #tpu.pipeline_mode<synchronous>, transform_indices = @transform_5, window_bounds = array<i64: 1, 768>}, {pipeline_mode = #tpu.pipeline_mode<synchronous>, transform_indices = @transform_6, window_bounds = array<i64: 8, 384>}]} {
    %c0 = arith.constant 0 : index
    %c0_0 = arith.constant 0 : index
    %0 = vector.load %arg6[%c0, %c0_0] : memref<1x768xf32, #tpu.memory_space<vmem>>, vector<1x768xf32>
    %c0_1 = arith.constant 0 : index
    %c0_2 = arith.constant 0 : index
    %c0_3 = arith.constant 0 : index
    %1 = vector.load %arg1[%c0_1, %c0_2, %c0_3] : memref<2x12x512xf32, #tpu.memory_space<vmem>>, vector<1x12x512xf32>
    %2 = vector.shape_cast %1 : vector<1x12x512xf32> to vector<12x512xf32>
    %3 = vector.extract_strided_slice %2 {offsets = [0, 0], sizes = [12, 384], strides = [1, 1]} : vector<12x512xf32> to vector<12x384xf32>
    %4 = vector.extract_strided_slice %2 {offsets = [0, 1], sizes = [12, 384], strides = [1, 1]} : vector<12x512xf32> to vector<12x384xf32>
    %5 = vector.extract_strided_slice %2 {offsets = [0, 2], sizes = [12, 384], strides = [1, 1]} : vector<12x512xf32> to vector<12x384xf32>
    %6 = vector.extract_strided_slice %2 {offsets = [0, 18], sizes = [12, 384], strides = [1, 1]} : vector<12x512xf32> to vector<12x384xf32>
    %7 = vector.extract_strided_slice %2 {offsets = [0, 19], sizes = [12, 384], strides = [1, 1]} : vector<12x512xf32> to vector<12x384xf32>
    %8 = vector.extract_strided_slice %2 {offsets = [0, 20], sizes = [12, 384], strides = [1, 1]} : vector<12x512xf32> to vector<12x384xf32>
    %9 = vector.extract_strided_slice %2 {offsets = [0, 36], sizes = [12, 384], strides = [1, 1]} : vector<12x512xf32> to vector<12x384xf32>
    %10 = vector.extract_strided_slice %2 {offsets = [0, 37], sizes = [12, 384], strides = [1, 1]} : vector<12x512xf32> to vector<12x384xf32>
    %11 = vector.extract_strided_slice %2 {offsets = [0, 38], sizes = [12, 384], strides = [1, 1]} : vector<12x512xf32> to vector<12x384xf32>
    %12 = tpu.concatenate %3, %4, %5, %6, %7, %8, %9, %10, %11 in 0 : vector<12x384xf32>, vector<12x384xf32>, vector<12x384xf32>, vector<12x384xf32>, vector<12x384xf32>, vector<12x384xf32>, vector<12x384xf32>, vector<12x384xf32>, vector<12x384xf32> -> vector<108x384xf32>
    %c1 = arith.constant 1 : index
    %c0_4 = arith.constant 0 : index
    %c0_5 = arith.constant 0 : index
    %13 = vector.load %arg1[%c1, %c0_4, %c0_5] : memref<2x12x512xf32, #tpu.memory_space<vmem>>, vector<1x12x512xf32>
    %14 = vector.shape_cast %13 : vector<1x12x512xf32> to vector<12x512xf32>
    %15 = vector.extract_strided_slice %14 {offsets = [0, 0], sizes = [12, 384], strides = [1, 1]} : vector<12x512xf32> to vector<12x384xf32>
    %16 = vector.extract_strided_slice %14 {offsets = [0, 1], sizes = [12, 384], strides = [1, 1]} : vector<12x512xf32> to vector<12x384xf32>
    %17 = vector.extract_strided_slice %14 {offsets = [0, 2], sizes = [12, 384], strides = [1, 1]} : vector<12x512xf32> to vector<12x384xf32>
    %18 = vector.extract_strided_slice %14 {offsets = [0, 18], sizes = [12, 384], strides = [1, 1]} : vector<12x512xf32> to vector<12x384xf32>
    %19 = vector.extract_strided_slice %14 {offsets = [0, 19], sizes = [12, 384], strides = [1, 1]} : vector<12x512xf32> to vector<12x384xf32>
    %20 = vector.extract_strided_slice %14 {offsets = [0, 20], sizes = [12, 384], strides = [1, 1]} : vector<12x512xf32> to vector<12x384xf32>
    %21 = vector.extract_strided_slice %14 {offsets = [0, 36], sizes = [12, 384], strides = [1, 1]} : vector<12x512xf32> to vector<12x384xf32>
    %22 = vector.extract_strided_slice %14 {offsets = [0, 37], sizes = [12, 384], strides = [1, 1]} : vector<12x512xf32> to vector<12x384xf32>
    %23 = vector.extract_strided_slice %14 {offsets = [0, 38], sizes = [12, 384], strides = [1, 1]} : vector<12x512xf32> to vector<12x384xf32>
    %24 = tpu.concatenate %15, %16, %17, %18, %19, %20, %21, %22, %23 in 0 : vector<12x384xf32>, vector<12x384xf32>, vector<12x384xf32>, vector<12x384xf32>, vector<12x384xf32>, vector<12x384xf32>, vector<12x384xf32>, vector<12x384xf32>, vector<12x384xf32> -> vector<108x384xf32>
    %25 = tpu.concatenate %12, %24 in 1 : vector<108x384xf32>, vector<108x384xf32> -> vector<108x768xf32>
    %c0_6 = arith.constant 0 : index
    %c0_7 = arith.constant 0 : index
    %26 = vector.load %arg2[%c0_6, %c0_7] : memref<8x108xf32, #tpu.memory_space<vmem>>, vector<8x108xf32>
    %cst = arith.constant dense<0.000000e+00> : vector<8x768xf32>
    %27 = tpu.matmul %26, %25, %cst {dimension_numbers = #tpu.dot_dimension_numbers<[1], [0], [0], [1], [0, 0, 1, 1], [], []>} : vector<8x108xf32>, vector<108x768xf32>, vector<8x768xf32> -> vector<8x768xf32>
    %c0_8 = arith.constant 0 : index
    %c0_9 = arith.constant 0 : index
    %28 = vector.load %arg3[%c0_8, %c0_9] : memref<8x1xf32, #tpu.memory_space<vmem>>, vector<8x1xf32>
    %29 = vector.broadcast %28 : vector<8x1xf32> to vector<8x768xf32>
    %30 = arith.addf %27, %29 : vector<8x768xf32>
    %cst_10 = arith.constant 0.000000e+00 : f32
    %31 = vector.broadcast %cst_10 : f32 to vector<8x768xf32>
    %32 = arith.maximumf %30, %31 : vector<8x768xf32>
    %33 = vector.broadcast %0 : vector<1x768xf32> to vector<8x768xf32>
    %34 = arith.mulf %32, %33 : vector<8x768xf32>
    %cst_11 = arith.constant 0.000000e+00 : f32
    %35 = vector.broadcast %cst_11 : f32 to vector<8x1024xf32>
    %c0_12 = arith.constant 0 : index
    %c0_13 = arith.constant 0 : index
    %36 = vector.load %arg8[%c0_12, %c0_13] : memref<8x1024xf32, #tpu.memory_space<vmem>>, vector<8x1024xf32>
    tpu.vector_store %arg8[%c0_12, %c0_13], %35 {strides = array<i32>} : memref<8x1024xf32, #tpu.memory_space<vmem>>, vector<8x1024xf32>,
    %37 = vector.extract_strided_slice %34 {offsets = [0, 0], sizes = [8, 384], strides = [1, 1]} : vector<8x768xf32> to vector<8x384xf32>
    %c0_14 = arith.constant 0 : index
    %c19 = arith.constant 19 : index
    %38 = vector.load %arg8[%c0_14, %c19] : memref<8x1024xf32, #tpu.memory_space<vmem>>, vector<8x384xf32>
    tpu.vector_store %arg8[%c0_14, %c19], %37 {strides = array<i32>} : memref<8x1024xf32, #tpu.memory_space<vmem>>, vector<8x384xf32>,
    %39 = vector.extract_strided_slice %34 {offsets = [0, 384], sizes = [8, 384], strides = [1, 1]} : vector<8x768xf32> to vector<8x384xf32>
    %c0_15 = arith.constant 0 : index
    %c531 = arith.constant 531 : index
    %40 = vector.load %arg8[%c0_15, %c531] : memref<8x1024xf32, #tpu.memory_space<vmem>>, vector<8x384xf32>
    tpu.vector_store %arg8[%c0_15, %c531], %39 {strides = array<i32>} : memref<8x1024xf32, #tpu.memory_space<vmem>>, vector<8x384xf32>,
    %c0_16 = arith.constant 0 : index
    %c0_17 = arith.constant 0 : index
    %41 = vector.load %arg8[%c0_16, %c0_17] : memref<8x1024xf32, #tpu.memory_space<vmem>>, vector<8x1024xf32>
    %42 = vector.extract_strided_slice %41 {offsets = [0, 0], sizes = [8, 384], strides = [1, 1]} : vector<8x1024xf32> to vector<8x384xf32>
    %43 = vector.extract_strided_slice %41 {offsets = [0, 1], sizes = [8, 384], strides = [1, 1]} : vector<8x1024xf32> to vector<8x384xf32>
    %44 = vector.extract_strided_slice %41 {offsets = [0, 2], sizes = [8, 384], strides = [1, 1]} : vector<8x1024xf32> to vector<8x384xf32>
    %45 = vector.extract_strided_slice %41 {offsets = [0, 18], sizes = [8, 384], strides = [1, 1]} : vector<8x1024xf32> to vector<8x384xf32>
    %46 = vector.extract_strided_slice %41 {offsets = [0, 19], sizes = [8, 384], strides = [1, 1]} : vector<8x1024xf32> to vector<8x384xf32>
    %47 = vector.extract_strided_slice %41 {offsets = [0, 20], sizes = [8, 384], strides = [1, 1]} : vector<8x1024xf32> to vector<8x384xf32>
    %48 = vector.extract_strided_slice %41 {offsets = [0, 36], sizes = [8, 384], strides = [1, 1]} : vector<8x1024xf32> to vector<8x384xf32>
    %49 = vector.extract_strided_slice %41 {offsets = [0, 37], sizes = [8, 384], strides = [1, 1]} : vector<8x1024xf32> to vector<8x384xf32>
    %50 = vector.extract_strided_slice %41 {offsets = [0, 38], sizes = [8, 384], strides = [1, 1]} : vector<8x1024xf32> to vector<8x384xf32>
    %51 = tpu.concatenate %42, %43, %44, %45, %46, %47, %48, %49, %50 in 0 : vector<8x384xf32>, vector<8x384xf32>, vector<8x384xf32>, vector<8x384xf32>, vector<8x384xf32>, vector<8x384xf32>, vector<8x384xf32>, vector<8x384xf32>, vector<8x384xf32> -> vector<72x384xf32>
    %52 = vector.extract_strided_slice %41 {offsets = [0, 512], sizes = [8, 384], strides = [1, 1]} : vector<8x1024xf32> to vector<8x384xf32>
    %53 = vector.extract_strided_slice %41 {offsets = [0, 513], sizes = [8, 384], strides = [1, 1]} : vector<8x1024xf32> to vector<8x384xf32>
    %54 = vector.extract_strided_slice %41 {offsets = [0, 514], sizes = [8, 384], strides = [1, 1]} : vector<8x1024xf32> to vector<8x384xf32>
    %55 = vector.extract_strided_slice %41 {offsets = [0, 530], sizes = [8, 384], strides = [1, 1]} : vector<8x1024xf32> to vector<8x384xf32>
    %56 = vector.extract_strided_slice %41 {offsets = [0, 531], sizes = [8, 384], strides = [1, 1]} : vector<8x1024xf32> to vector<8x384xf32>
    %57 = vector.extract_strided_slice %41 {offsets = [0, 532], sizes = [8, 384], strides = [1, 1]} : vector<8x1024xf32> to vector<8x384xf32>
    %58 = vector.extract_strided_slice %41 {offsets = [0, 548], sizes = [8, 384], strides = [1, 1]} : vector<8x1024xf32> to vector<8x384xf32>
    %59 = vector.extract_strided_slice %41 {offsets = [0, 549], sizes = [8, 384], strides = [1, 1]} : vector<8x1024xf32> to vector<8x384xf32>
    %60 = vector.extract_strided_slice %41 {offsets = [0, 550], sizes = [8, 384], strides = [1, 1]} : vector<8x1024xf32> to vector<8x384xf32>
    %61 = tpu.concatenate %52, %53, %54, %55, %56, %57, %58, %59, %60 in 0 : vector<8x384xf32>, vector<8x384xf32>, vector<8x384xf32>, vector<8x384xf32>, vector<8x384xf32>, vector<8x384xf32>, vector<8x384xf32>, vector<8x384xf32>, vector<8x384xf32> -> vector<72x384xf32>
    %62 = tpu.concatenate %51, %61 in 1 : vector<72x384xf32>, vector<72x384xf32> -> vector<72x768xf32>
    %c0_18 = arith.constant 0 : index
    %c0_19 = arith.constant 0 : index
    %63 = vector.load %arg4[%c0_18, %c0_19] : memref<4x72xf32, #tpu.memory_space<vmem>>, vector<4x72xf32>
    %cst_20 = arith.constant dense<0.000000e+00> : vector<4x768xf32>
    %64 = tpu.matmul %63, %62, %cst_20 {dimension_numbers = #tpu.dot_dimension_numbers<[1], [0], [0], [1], [0, 0, 1, 1], [], []>} : vector<4x72xf32>, vector<72x768xf32>, vector<4x768xf32> -> vector<4x768xf32>
    %c0_21 = arith.constant 0 : index
    %c0_22 = arith.constant 0 : index
    %65 = vector.load %arg5[%c0_21, %c0_22] : memref<4x1xf32, #tpu.memory_space<vmem>>, vector<4x1xf32>
    %66 = vector.broadcast %65 : vector<4x1xf32> to vector<4x768xf32>
    %67 = arith.addf %64, %66 : vector<4x768xf32>
    %cst_23 = arith.constant 0.000000e+00 : f32
    %68 = vector.broadcast %cst_23 : f32 to vector<4x768xf32>
    %69 = arith.maximumf %67, %68 : vector<4x768xf32>
    %70 = vector.extract_strided_slice %69 {offsets = [0, 0], sizes = [4, 384], strides = [1, 1]} : vector<4x768xf32> to vector<4x384xf32>
    %71 = vector.extract_strided_slice %69 {offsets = [0, 384], sizes = [4, 384], strides = [1, 1]} : vector<4x768xf32> to vector<4x384xf32>
    %72 = tpu.concatenate %70, %71 in 0 : vector<4x384xf32>, vector<4x384xf32> -> vector<8x384xf32>
    %c0_24 = arith.constant 0 : index
    %c0_25 = arith.constant 0 : index
    %73 = vector.load %arg7[%c0_24, %c0_25] : memref<8x384xf32, #tpu.memory_space<vmem>>, vector<8x384xf32>
    tpu.vector_store %arg7[%c0_24, %c0_25], %72 {strides = array<i32>} : memref<8x384xf32, #tpu.memory_space<vmem>>, vector<8x384xf32>,
    return
  }
  func.func @transform_0(%arg0: i32) -> (i32, i32, i32) {
    %c0_i32 = arith.constant 0 : i32
    %c0_i32_0 = arith.constant 0 : i32
    %c0_i32_1 = arith.constant 0 : i32
    %c0_i32_2 = arith.constant 0 : i32
    return %c0_i32, %c0_i32_0, %c0_i32_1 : i32, i32, i32
  }
  func.func @transform_1(%arg0: i32) -> (i32, i32) {
    %c0_i32 = arith.constant 0 : i32
    %c0_i32_0 = arith.constant 0 : i32
    %c0_i32_1 = arith.constant 0 : i32
    return %c0_i32, %c0_i32_0 : i32, i32
  }
  func.func @transform_2(%arg0: i32) -> (i32, i32) {
    %c0_i32 = arith.constant 0 : i32
    %c0_i32_0 = arith.constant 0 : i32
    %c0_i32_1 = arith.constant 0 : i32
    return %c0_i32, %c0_i32_0 : i32, i32
  }
  func.func @transform_3(%arg0: i32) -> (i32, i32) {
    %c0_i32 = arith.constant 0 : i32
    %c0_i32_0 = arith.constant 0 : i32
    %c0_i32_1 = arith.constant 0 : i32
    return %c0_i32, %c0_i32_0 : i32, i32
  }
  func.func @transform_4(%arg0: i32) -> (i32, i32) {
    %c0_i32 = arith.constant 0 : i32
    %c0_i32_0 = arith.constant 0 : i32
    %c0_i32_1 = arith.constant 0 : i32
    return %c0_i32, %c0_i32_0 : i32, i32
  }
  func.func @transform_5(%arg0: i32) -> (i32, i32) {
    %c0_i32 = arith.constant 0 : i32
    %c0_i32_0 = arith.constant 0 : i32
    %c0_i32_1 = arith.constant 0 : i32
    return %c0_i32, %c0_i32_0 : i32, i32
  }
  func.func @transform_6(%arg0: i32) -> (i32, i32) {
    %c0_i32 = arith.constant 0 : i32
    %c0_i32_0 = arith.constant 0 : i32
    %c0_i32_1 = arith.constant 0 : i32
    return %c0_i32, %c0_i32_0 : i32, i32
  }
}

</mosaic_0001>

<bundles_post_ra>
// kernel: up_forward.1
= control target key start
LH: loop header
LB: loop body
LE: loop exit
PB: predicated region body
PF: predicated region fallthrough
CT: control target
= control target key end

     0   :  { %vm40_vm0 = vcmask 1043456   ;;  %s1998_s9 = smov 126   ;;  %s1999_s10 = smov 127   ;;  %v2006_v53 = vmov 0.0   ;;  %vm69_vm1 = vcmask 1039360   ;;  %vm98_vm2 = vcmask 1031168   ;;  %s2966_s0 = inlined_call_operand.vmem [shape: f32[2,12,512], index: 0, kind: input, shape index: {}]   ;;  %s2967_s2 = inlined_call_operand.vmem [shape: f32[8,1], index: 2, kind: input, shape index: {}]   ;;  %s2968_s1 = inlined_call_operand.vmem [shape: f32[8,108], index: 1, kind: input, shape index: {}]   ;;  %s2969_s5 = inlined_call_operand.vmem [shape: f32[1,768], index: 5, kind: input, shape index: {}]   ;;  %s2970_s4 = inlined_call_operand.vmem [shape: f32[4,1], index: 4, kind: input, shape index: {}]   ;;  %s2971_s3 = inlined_call_operand.vmem [shape: f32[4,72], index: 3, kind: input, shape index: {}]   ;;  %s2972_s6 = inlined_call_operand.vmem [shape: f32[8,384], index: 6, kind: output, shape index: {}]  }
   0x1   :  { %v2048_v0 = vld [vmem:[%s2966_s0 + $0x8] sm:$0xff]  ;;  %v2053_v1 = vld [vmem:[%s2966_s0 + $0x10] sm:$0xff]  ;;  %v2058_v2 = vld [vmem:[%s2966_s0] sm:$0xff]  ;;  %s2000_s19 = smov 110   ;;  %s2001_s22 = smov 109   ;;  %642 = vmatprep.mubr.f32.mxu0 %v2006_v53  ;;  %834 = vst [vmem:[#allocation2] sm:$0xff] %v2006_v53  ;;  %713 = vmatprep.mubr.f32.mxu1 %v2006_v53 }
   0x2   :  { %v2062_v3 = vpack.i.bf16 %v2053_v1, %v2048_v0  ;;  %v42_v4 = vrot.slane %v2048_v0, 4  ;;  %v43_v5 = vrot.slane %v2053_v1, 4  ;;  %v2069_v6 = vld [vmem:[%s2966_s0 + $0x20] sm:$0xf]  ;;  %v2074_v7 = vld [vmem:[%s2966_s0 + $0x30] sm:$0xf] }
   0x3   :  { %v41_v8 = vrot.slane %v2058_v2, 4  ;;  %v45_v9 = vrot.slane %v2069_v6, 4  ;;  %v49_v10 = vrot.slane %v2074_v7, 4  ;;  %v2082_v11 = vld [vmem:[%s2966_s0 + $0x28] sm:$0xf]  ;;  %v1566_v19 = vpack.i.bf16 %v2069_v6, %v2074_v7  ;;  %v2100_v20 = vld [vmem:[%s2966_s0 + $0x40] sm:$0xff] }
   0x4   :  { %1542 = vrot.lane.b32.xlu1 %v2062_v3, %s1998_s9  ;;  %v2086_v12 = vpack.i.bf16 %v43_v5, %v42_v4  ;;  %v47_v13 = vrot.slane %v2082_v11, 4  ;;  %v2105_v21 = vld [vmem:[%s2966_s0 + $0x48] sm:$0xff]  ;;  %v1556_v22 = vpack.i.bf16 %v2082_v11, %v2058_v2  ;;  %v2113_v23 = vld [vmem:[%s2966_s0 + $0x60] sm:$0xf]  ;;  %v311_v24 = vrot.slane %v2100_v20, 4  ;;  %v2121_v26 = vld [vmem:[%s2966_s0 + $0x18] sm:$0xff] }
   0x5   :  { %v46_v14 = vsel %vm40_vm0, %v41_v8, %v45_v9  ;;  %v50_v15 = vsel %vm40_vm0, %v43_v5, %v49_v10  ;;  %v312_v25 = vrot.slane %v2105_v21, 4  ;;  %v315_v27 = vrot.slane %v2113_v23, 4  ;;  %v2137_v32 = vld [vmem:[%s2966_s0 + $0x38] sm:$0xf]  ;;  %v2150_v35 = vld [vmem:[%s2966_s0 + $0x68] sm:$0xf] }
   0x6   :  { %1547 = vrot.lane.b32.xlu0 %v2086_v12, %s1999_s10  ;;  %v1561_v16 = vpack.i.bf16 %v46_v14, %v50_v15  ;;  %v48_v17 = vsel %vm40_vm0, %v42_v4, %v47_v13  ;;  %v44_v29 = vrot.slane %v2121_v26, 4  ;;  %v1596_v33 = vpack.i.bf16 %v2074_v7, %v2082_v11  ;;  %s2002_s25 = smov 108   ;;  %s2003_s26 = smov 92   ;;  %v2208_v48 = vld [vmem:[%s2966_s0 + $0x50] sm:$0xff]  ;;  %v1374_v49 = vld [vmem:[%s2966_s0 + $0x58] sm:$0xff]  ;;  %837 = vst [vmem:[#allocation2 + $0x18] sm:$0xff] %v2006_v53 }
   0x7   :  { %v1551_v18 = vpack.i.bf16 %v48_v17, %v41_v8  ;;  %v2126_v28 = vpack.i.bf16 %v312_v25, %v311_v24  ;;  %v316_v30 = vsel %vm40_vm0, %v311_v24, %v315_v27  ;;  %v1801_v34 = vpack.i.bf16 %v2137_v32, %v2121_v26  ;;  %s2004_s27 = smov 91   ;;  %s2005_s8 = smov 90   ;;  %838 = vst [vmem:[#allocation2 + $0x20] sm:$0xff] %v2006_v53  ;;  %v2233_v55 = vld [vmem:[%s2966_s0 + $0x70] sm:$0xf] }
   0x8   :  { %1562 = vrot.lane.b32.xlu1 %v1561_v16, %s1999_s10  ;;  %v2132_v31 = vpack.i.bf16 %v316_v30, %v44_v29  ;;  %v51_v36 = vrot.slane %v2137_v32, 4  ;;  %v317_v37 = vrot.slane %v2150_v35, 4  ;;  %v1611_v38 = vpack.i.bf16 %v2058_v2, %v2069_v6  ;;  %841 = vst [vmem:[#allocation2 + $0x38] sm:$0xff] %v2006_v53  ;;  %v1378_v56 = vld [vmem:[%s2966_s0 + $0x78] sm:$0xf]  ;;  %s2009_s18 = smov 19  }
   0x9   :  { %v2167_v41 = vpack.i.bf16 %v2105_v21, %v2100_v20  ;;  %v1631_v43 = vpack.i.bf16 %v2113_v23, %v2121_v26  ;;  %v1651_v44 = vpack.i.bf16 %v2137_v32, %v2150_v35  ;;  %v1691_v45 = vpack.i.bf16 %v2150_v35, %v2113_v23 }
   0xa   :  { %1552 = vrot.lane.b32.xlu0 %v1551_v18, %s1999_s10  ;;  %v52_v39 = vsel %vm40_vm0, %v44_v29, %v51_v36  ;;  %v318_v40 = vsel %vm40_vm0, %v312_v25, %v317_v37  ;;  %v1701_v46 = vpack.i.bf16 %v2100_v20, %v2137_v32  ;;  %v1711_v47 = vpack.i.bf16 %v2121_v26, %v2105_v21  ;;  %v557_v36 = vld [vmem:[%s2967_s2] sm:$0xff] }
   0xb   :  { %v1621_v42 = vpack.i.bf16 %v52_v39, %v318_v40  ;;  %v1726_v50 = vpack.i.bf16 %v2069_v6, %v2058_v2  ;;  %v313_v51 = vrot.slane %v2208_v48, 4  ;;  %v314_v52 = vrot.slane %v1374_v49, 4 }
   0xc   :  { %1567 = vrot.lane.b32.xlu1 %v1566_v19, %s1998_s9  ;;  %v319_v57 = vrot.slane %v2233_v55, 4  ;;  %v321_v58 = vrot.slane %v1378_v56, 4  ;;  %v1776_v61 = vpack.i.bf16 %v1374_v49, %v2208_v48  ;;  %v1781_v63 = vpack.i.bf16 %v1378_v56, %v2233_v55 }
   0xd   :  { %v1731_v54 = vpack.i.bf16 %v314_v52, %v313_v51  ;;  %v2007_v30 = vmov 0   ;;  %vm127_vm3 = vcmask 900096   ;;  %vm156_vm4 = vcmask 891904  }
   0xe   :  { %1557 = vrot.lane.b32.xlu0 %v1556_v22, %s1998_s9  ;;  %v320_v59 = vsel %vm40_vm0, %v313_v51, %v319_v57  ;;  %v322_v60 = vsel %vm40_vm0, %v314_v52, %v321_v58  ;;  %1997 = vset.pattern.permute.xlu1 %v2007_v30  ;;  %vm185_vm5 = vcmask 883712   ;;  %vm214_vm6 = vcmask 752640  }
   0xf   :  { %v1771_v62 = vpack.i.bf16 %v322_v60, %v320_v59  ;;  %1861 = vset.pattern.permute.xlu0 %v2007_v30  ;;  %vm243_vm7 = vcmask 744448   ;;  %vm272_vm8 = vcmask 736256   ;;  %vm2008_vm9 = vmmov 1  }
  0x10   :  { %1577 = vrot.lane.b32.xlu1 %v1551_v18, %s2000_s19  ;;  %vm2526_vm10 = vmpackc.low %vm40_vm0, %vm2008_vm9  ;;  %vm858_vm11 = vcmask 1047704   ;;  %vm851_vm12 = vcmask 154624   ;;  %vm1129_vm13 = vcmask 588800  }
  0x12   :  { %1572 = vrot.lane.b32.xlu0 %v2086_v12, %s2000_s19 }
  0x14   :  { %1587 = vrot.lane.b32.xlu1 %v2126_v28, %s1999_s10 }
  0x16   :  { %1582 = vrot.lane.b32.xlu0 %v1561_v16, %s2000_s19 }
  0x18   :  { %1597 = vrot.lane.b32.xlu1 %v1596_v33, %s2001_s22 }
  0x1a   :  { %1592 = vrot.lane.b32.xlu0 %v2132_v31, %s1999_s10 }
  0x1c   :  { %1607 = vrot.lane.b32.xlu1 %v2062_v3, %s2001_s22 }
  0x1e   :  { %1602 = vrot.lane.b32.xlu0 %v2086_v12, %s2002_s25 }
  0x20   :  { %1617 = vrot.lane.b32.xlu1 %v1551_v18, %s2002_s25 }
  0x22   :  { %1612 = vrot.lane.b32.xlu0 %v1611_v38, %s2001_s22 }
  0x24   :  { %1627 = vrot.lane.b32.xlu1 %v2167_v41, %s1998_s9 }
  0x26   :  { %1622 = vrot.lane.b32.xlu0 %v1621_v42, %s1999_s10 }
  0x28   :  { %1637 = vrot.lane.b32.xlu1 %v1561_v16, %s2002_s25 }
  0x2a   :  { %1632 = vrot.lane.b32.xlu0 %v1631_v43, %s1998_s9 }
  0x2c   :  { %1647 = vrot.lane.b32.xlu1 %v1556_v22, %s2003_s26 }
  0x2e   :  { %1642 = vrot.lane.b32.xlu0 %v2062_v3, %s2003_s26 }
  0x30   :  { %1657 = vrot.lane.b32.xlu1 %v2126_v28, %s2000_s19 }
  0x32   :  { %1652 = vrot.lane.b32.xlu0 %v1651_v44, %s1998_s9 }
  0x34   :  { %1667 = vrot.lane.b32.xlu1 %v1566_v19, %s2003_s26 }
  0x36   :  { %1662 = vrot.lane.b32.xlu0 %v2132_v31, %s2000_s19 }
  0x38   :  { %1677 = vrot.lane.b32.xlu1 %v1621_v42, %s2000_s19 }
  0x3a   :  { %1672 = vrot.lane.b32.xlu0 %v2086_v12, %s2004_s27 }
  0x3c   :  { %1687 = vrot.lane.b32.xlu1 %v1561_v16, %s2004_s27 }
  0x3e   :  { %1682 = vrot.lane.b32.xlu0 %v1551_v18, %s2004_s27 }
  0x40   :  { %1697 = vrot.lane.b32.xlu1 %v2126_v28, %s2002_s25 }
  0x42   :  { %1692 = vrot.lane.b32.xlu0 %v1691_v45, %s2001_s22 }
  0x44   :  { %1707 = vrot.lane.b32.xlu1 %v2132_v31, %s2002_s25 }
  0x46   :  { %1702 = vrot.lane.b32.xlu0 %v1701_v46, %s2001_s22 }
  0x48   :  { %1717 = vrot.lane.b32.xlu1 %v2062_v3, %s2005_s8 }
  0x4a   :  { %1712 = vrot.lane.b32.xlu0 %v1711_v47, %s2001_s22 }
  0x4c   :  { %1727 = vrot.lane.b32.xlu1 %v1726_v50, %s2005_s8 }
  0x4e   :  { %1722 = vrot.lane.b32.xlu0 %v1596_v33, %s2005_s8 }
  0x50   :  { %1737 = vrot.lane.b32.xlu1 %v1621_v42, %s2002_s25 }
  0x52   :  { %1732 = vrot.lane.b32.xlu0 %v1731_v54, %s1999_s10 }
  0x54   :  { %1747 = vrot.lane.b32.xlu1 %v1631_v43, %s2003_s26 }
  0x56   :  { %1742 = vrot.lane.b32.xlu0 %v2167_v41, %s2003_s26 }
  0x58   :  { %1757 = vrot.lane.b32.xlu1 %v2126_v28, %s2004_s27 }
  0x5a   :  { %1752 = vrot.lane.b32.xlu0 %v1651_v44, %s2003_s26 }
  0x5c   :  { %1767 = vrot.lane.b32.xlu1 %v1621_v42, %s2004_s27 }
  0x5e   :  { %1762 = vrot.lane.b32.xlu0 %v2132_v31, %s2004_s27 }
  0x60   :  { %1777 = vrot.lane.b32.xlu1 %v1776_v61, %s1998_s9 }
  0x62   :  { %1772 = vrot.lane.b32.xlu0 %v1771_v62, %s1999_s10 }
  0x64   :  { %1787 = vrot.lane.b32.xlu1 %v1731_v54, %s2000_s19 }
  0x66   :  { %1782 = vrot.lane.b32.xlu0 %v1781_v63, %s1998_s9 }
  0x68   :  { %1797 = vrot.lane.b32.xlu1 %v1691_v45, %s2005_s8 }
  0x6a   :  { %1792 = vrot.lane.b32.xlu0 %v2167_v41, %s2005_s8 }
  0x6c   :  { %1807 = vrot.lane.b32.xlu1 %v1771_v62, %s2000_s19 }
  0x6e   :  { %1802 = vrot.lane.b32.xlu0 %v1801_v34, %s2005_s8 }
  0x70   :  { %1817 = vrot.lane.b32.xlu1 %v1731_v54, %s2002_s25 }
  0x72   :  { %1812 = vrot.lane.b32.xlu0 %v1781_v63, %s2001_s22 }
  0x74   :  { %1827 = vrot.lane.b32.xlu1 %v1771_v62, %s2002_s25 }
  0x76   :  { %v2266_v3 = vpop.permute.xlu1 %1542  ;;  %1822 = vrot.lane.b32.xlu0 %v1776_v61, %s2001_s22 }
  0x77   :  { %v1545_v10 = vunpack.i.h.bf16 %v2266_v3  ;;  %v1544_v12 = vunpack.i.l.bf16 %v2266_v3 }
  0x78   :  { %v2269_v4 = vpop.permute.xlu0 %1547  ;;  %1837 = vrot.lane.b32.xlu1 %v1781_v63, %s2003_s26 }
  0x79   :  { %v1550_v5 = vunpack.i.h.bf16 %v2269_v4  ;;  %v1549_v8 = vunpack.i.l.bf16 %v2269_v4 }
  0x7a   :  { %1832 = vrot.lane.b32.xlu0 %v1776_v61, %s2003_s26  ;;  %v2275_v9 = vpop.permute.xlu1 %1562 }
  0x7b   :  { %v1564_v13 = vunpack.i.l.bf16 %v2275_v9  ;;  %v71_v14 = vsel %vm69_vm1, %v1549_v8, %v1550_v5  ;;  %v1565_v24 = vunpack.i.h.bf16 %v2275_v9 }
  0x7c   :  { %v1553_v15 = vpop.permute.xlu0 %1552  ;;  %1847 = vrot.lane.b32.xlu1 %v1771_v62, %s2004_s27  ;;  %v283_v16 = vsel %vm40_vm0, %v2082_v11, %v71_v14  ;;  %v100_v11 = vsel %vm98_vm2, %v1544_v12, %v1545_v10 }
  0x7d   :  { %v1555_v17 = vunpack.i.h.bf16 %v1553_v15  ;;  %v1554_v18 = vunpack.i.l.bf16 %v1553_v15  ;;  %v1391_v19 = vpack.c.bf16 %v283_v16, %v2048_v0 }
  0x7e   :  { %1842 = vrot.lane.b32.xlu0 %v1731_v54, %s2004_s27  ;;  %v2288_v22 = vpop.permute.xlu1 %1567 }
  0x7f   :  { %1392 = vmatprep.subr.bf16.mxu0 %v1391_v19  ;;  %v70_v25 = vsel %vm69_vm1, %v1554_v18, %v1549_v8  ;;  %v74_v26 = vsel %vm69_vm1, %v1555_v17, %v1564_v13  ;;  %v73_v33 = vsel %vm69_vm1, %v1565_v24, %v1555_v17  ;;  %v1570_v40 = vunpack.i.h.bf16 %v2288_v22 }
  0x80   :  { %v1558_v27 = vpop.permute.xlu0 %1557  ;;  %1857 = vrot.lane.b32.xlu1 %v1781_v63, %s2005_s8  ;;  %v282_v0 = vsel %vm40_vm0, %v2069_v6, %v70_v25  ;;  %v1395_v32 = vpack.c.bf16 %v100_v11, %v74_v26  ;;  %v1569_v41 = vunpack.i.l.bf16 %v2288_v22 }
  0x81   :  { %v1559_v28 = vunpack.i.l.bf16 %v1558_v27  ;;  %v1393_v29 = vpack.c.bf16 %v282_v0, %v2058_v2  ;;  %v1560_v42 = vunpack.i.h.bf16 %v1558_v27 }
  0x82   :  { %1852 = vrot.lane.b32.xlu0 %v1776_v61, %s2005_s8  ;;  %v1578_v31 = vpop.permute.xlu1 %1577 }
  0x83   :  { %1394 = vmatpush1.bf16.msra.mxu0 %v1393_v29  ;;  %v99_v34 = vsel %vm98_vm2, %v1559_v28, %v1544_v12  ;;  %v1579_v6 = vunpack.i.l.bf16 %v1578_v31  ;;  %v1580_v44 = vunpack.i.h.bf16 %v1578_v31  ;;  %v103_v57 = vsel %vm98_vm2, %v1560_v42, %v1569_v41 }
  0x84   :  { %v2308_v37 = vpop.permute.xlu0 %1572  ;;  %1396 = vmatprep.subr.bf16.mxu0 %v1395_v32  ;;  %v1397_v2 = vpack.c.bf16 %v99_v34, %v73_v33  ;;  %v102_v58 = vsel %vm98_vm2, %v1570_v40, %v1560_v42 }
  0x85   :  { %v1575_v38 = vunpack.i.h.bf16 %v2308_v37  ;;  %v1574_v39 = vunpack.i.l.bf16 %v2308_v37 }
  0x86   :  { %v2314_v43 = vpop.permute.xlu1 %1587  ;;  %560 = vperm.xlu0 %1861, %v557_v36  }
  0x87   :  { %v1590_v45 = vunpack.i.h.bf16 %v2314_v43  ;;  %v1589_v46 = vunpack.i.l.bf16 %v2314_v43  ;;  %1398 = vmatpush1.bf16.msra.mxu0 %v1397_v2  ;;  %v129_v49 = vsel %vm127_vm3, %v1574_v39, %v1575_v38  ;;  %v128_v50 = vsel %vm127_vm3, %v1579_v6, %v1574_v39 }
  0x88   :  { %v2318_v47 = vpop.permute.xlu0 %1582  ;;  %v286_v61 = vsel %vm40_vm0, %v103_v57, %v129_v49  ;;  %v285_v63 = vsel %vm40_vm0, %v102_v58, %v128_v50 }
  0x89   :  { %v1585_v51 = vunpack.i.h.bf16 %v2318_v47  ;;  %v1584_v52 = vunpack.i.l.bf16 %v2318_v47  ;;  %v339_v54 = vsel %vm69_vm1, %v1589_v46, %v1590_v45 }
  0x8a   :  { %v2329_v56 = vpop.permute.xlu1 %1597  ;;  %v544_v59 = vsel %vm40_vm0, %v2113_v23, %v339_v54 }
  0x8b   :  { %v132_v60 = vsel %vm127_vm3, %v1580_v44, %v1584_v52  ;;  %v131_v62 = vsel %vm127_vm3, %v1585_v51, %v1580_v44  ;;  %v1421_v15 = vpack.c.bf16 %v544_v59, %v2100_v20  ;;  %v1600_v16 = vunpack.i.h.bf16 %v2329_v56 }
  0x8c   :  { %v1593_v8 = vpop.permute.xlu0 %1592  ;;  %v1399_v12 = vpack.c.bf16 %v132_v60, %v286_v61  ;;  %v1401_v14 = vpack.c.bf16 %v131_v62, %v285_v63  ;;  %v1599_v17 = vunpack.i.l.bf16 %v2329_v56 }
  0x8d   :  { %v1594_v23 = vunpack.i.l.bf16 %v1593_v8  ;;  %1422 = vmatprep.subr.bf16.mxu1 %v1421_v15  ;;  %v1595_v46 = vunpack.i.h.bf16 %v1593_v8 }
  0x8e   :  { %v2346_v18 = vpop.permute.xlu1 %1607  ;;  %1400 = vmatprep.subr.bf16.mxu0 %v1399_v12  ;;  %v161_v28 = vsel %vm156_vm4, %v1599_v17, %v1600_v16 }
  0x8f   :  { %v1610_v19 = vunpack.i.h.bf16 %v2346_v18  ;;  %v1609_v24 = vunpack.i.l.bf16 %v2346_v18  ;;  %1402 = vmatpush1.bf16.msra.mxu0 %v1401_v14  ;;  %v72_v25 = vsel %vm69_vm1, %v1550_v5, %v1594_v23 }
  0x90   :  { %v2353_v20 = vpop.permute.xlu0 %1602  ;;  %v284_v26 = vsel %vm40_vm0, %v2074_v7, %v72_v25 }
  0x91   :  { %v1605_v11 = vunpack.i.h.bf16 %v2353_v20  ;;  %v1604_v27 = vunpack.i.l.bf16 %v2353_v20  ;;  %v1423_v0 = vpack.c.bf16 %v284_v26, %v2053_v1  ;;  %v158_v4 = vsel %vm156_vm4, %v1609_v24, %v1610_v19 }
  0x92   :  { %v1618_v29 = vpop.permute.xlu1 %1617 }
  0x93   :  { %v187_v5 = vsel %vm185_vm5, %v1604_v27, %v1605_v11  ;;  %v1619_v7 = vunpack.i.l.bf16 %v1618_v29  ;;  %1424 = vmatpush1.bf16.msra.mxu1 %v1423_v0 }
  0x94   :  { %v1613_v30 = vpop.permute.xlu0 %1612  ;;  %v289_v31 = vsel %vm40_vm0, %v161_v28, %v187_v5 }
  0x95   :  { %v1615_v32 = vunpack.i.h.bf16 %v1613_v30  ;;  %v1614_v1 = vunpack.i.l.bf16 %v1613_v30  ;;  %v1403_v33 = vpack.c.bf16 %v289_v31, %v158_v4  ;;  %v186_v34 = vsel %vm185_vm5, %v1619_v7, %v1604_v27 }
  0x96   :  { %v2371_v36 = vpop.permute.xlu1 %1627 }
  0x97   :  { %v160_v6 = vsel %vm156_vm4, %v1614_v1, %v1599_v17  ;;  %v1630_v2 = vunpack.i.h.bf16 %v2371_v36  ;;  %v1629_v39 = vunpack.i.l.bf16 %v2371_v36  ;;  %1404 = vmatprep.subr.bf16.mxu0 %v1403_v33  ;;  %v157_v40 = vsel %vm156_vm4, %v1615_v32, %v1609_v24 }
  0x98   :  { %v2377_v42 = vpop.permute.xlu0 %1622  ;;  %v288_v44 = vsel %vm40_vm0, %v160_v6, %v186_v34  ;;  %v1620_v24 = vunpack.i.h.bf16 %v1618_v29 }
  0x99   :  { %v1624_v49 = vunpack.i.l.bf16 %v2377_v42  ;;  %v1405_v50 = vpack.c.bf16 %v288_v44, %v157_v40  ;;  %v367_v51 = vsel %vm98_vm2, %v1629_v39, %v1630_v2  ;;  %v1625_v57 = vunpack.i.h.bf16 %v2377_v42 }
  0x9a   :  { %v2384_v54 = vpop.permute.xlu1 %1637 }
  0x9b   :  { %1406 = vmatpush1.bf16.msra.mxu0 %v1405_v50  ;;  %v342_v58 = vsel %vm69_vm1, %v1595_v46, %v1624_v49  ;;  %v1640_v62 = vunpack.i.h.bf16 %v2384_v54  ;;  %v1639_v8 = vunpack.i.l.bf16 %v2384_v54  ;;  %v75_v14 = vsel %vm69_vm1, %v1564_v13, %v1625_v57 }
  0x9c   :  { %v1633_v59 = vpop.permute.xlu0 %1632  ;;  %v1425_v60 = vpack.c.bf16 %v367_v51, %v342_v58 }
  0x9d   :  { %v1634_v61 = vunpack.i.l.bf16 %v1633_v59  ;;  %v190_v9 = vsel %vm185_vm5, %v1620_v24, %v1639_v8  ;;  %v1635_v32 = vunpack.i.h.bf16 %v1633_v59 }
  0x9e   :  { %v2391_v63 = vpop.permute.xlu1 %1647  ;;  %1426 = vmatprep.subr.bf16.mxu1 %v1425_v60 }
  0x9f   :  { %v1649_v12 = vunpack.i.l.bf16 %v2391_v63  ;;  %v101_v15 = vsel %vm98_vm2, %v1545_v10, %v1634_v61  ;;  %v189_v10 = vsel %vm185_vm5, %v1640_v62, %v1620_v24 }
  0xa0   :  { %v2401_v17 = vpop.permute.xlu0 %1642  ;;  %v1427_v23 = vpack.c.bf16 %v101_v15, %v75_v14 }
  0xa1   :  { %v1645_v25 = vunpack.i.h.bf16 %v2401_v17  ;;  %v1644_v26 = vunpack.i.l.bf16 %v2401_v17 }
  0xa2   :  { %v2405_v27 = vpop.permute.xlu1 %1657  ;;  %1428 = vmatpush1.bf16.msra.mxu1 %v1427_v23  ;;  %v1650_v23 = vunpack.i.h.bf16 %v2391_v63 }
  0xa3   :  { %v216_v3 = vsel %vm214_vm6, %v1644_v26, %v1645_v25  ;;  %v215_v13 = vsel %vm214_vm6, %v1649_v12, %v1644_v26  ;;  %v1660_v4 = vunpack.i.h.bf16 %v2405_v27  ;;  %v1659_v5 = vunpack.i.l.bf16 %v2405_v27 }
  0xa4   :  { %v2415_v0 = vpop.permute.xlu0 %1652  ;;  %v1407_v28 = vpack.c.bf16 %v216_v3, %v190_v9  ;;  %v1409_v29 = vpack.c.bf16 %v215_v13, %v189_v10 }
  0xa5   :  { %v1654_v7 = vunpack.i.l.bf16 %v2415_v0  ;;  %v1655_v30 = vunpack.i.h.bf16 %v2415_v0  ;;  %v395_v33 = vsel %vm127_vm3, %v1659_v5, %v1660_v4 }
  0xa6   :  { %v2421_v31 = vpop.permute.xlu1 %1667  ;;  %1408 = vmatprep.subr.bf16.mxu0 %v1407_v28 }
  0xa7   :  { %1410 = vmatpush1.bf16.msra.mxu0 %v1409_v29  ;;  %v370_v34 = vsel %vm98_vm2, %v1635_v32, %v1654_v7  ;;  %v104_v39 = vsel %vm98_vm2, %v1569_v41, %v1655_v30  ;;  %v1669_v60 = vunpack.i.l.bf16 %v2421_v31  ;;  %v1670_v14 = vunpack.i.h.bf16 %v2421_v31 }
  0xa8   :  { %v1663_v1 = vpop.permute.xlu0 %1662  ;;  %v547_v58 = vsel %vm40_vm0, %v370_v34, %v395_v33 }
  0xa9   :  { %v1664_v6 = vunpack.i.l.bf16 %v1663_v1  ;;  %v1665_v44 = vunpack.i.h.bf16 %v1663_v1  ;;  %v219_v3 = vsel %vm214_vm6, %v1650_v23, %v1669_v60  ;;  %v218_v13 = vsel %vm214_vm6, %v1670_v14, %v1650_v23 }
  0xaa   :  { %v2432_v40 = vpop.permute.xlu1 %1677 }
  0xab   :  { %v130_v46 = vsel %vm127_vm3, %v1575_v38, %v1664_v6  ;;  %v1680_v50 = vunpack.i.h.bf16 %v2432_v40  ;;  %v1679_v51 = vunpack.i.l.bf16 %v2432_v40 }
  0xac   :  { %v2439_v57 = vpop.permute.xlu0 %1672  ;;  %v287_v22 = vsel %vm40_vm0, %v104_v39, %v130_v46 }
  0xad   :  { %v1675_v41 = vunpack.i.h.bf16 %v2439_v57  ;;  %v1674_v59 = vunpack.i.l.bf16 %v2439_v57  ;;  %v398_v37 = vsel %vm127_vm3, %v1665_v44, %v1679_v51  ;;  %v133_v38 = vsel %vm127_vm3, %v1584_v52, %v1680_v50 }
  0xae   :  { %v2452_v61 = vpop.permute.xlu1 %1687  ;;  %v1429_v62 = vpack.c.bf16 %v398_v37, %v547_v58  ;;  %v1431_v12 = vpack.c.bf16 %v133_v38, %v287_v22 }
  0xaf   :  { %v1689_v15 = vunpack.i.l.bf16 %v2452_v61  ;;  %v245_v24 = vsel %vm243_vm7, %v1674_v59, %v1675_v41  ;;  %v1690_v47 = vunpack.i.h.bf16 %v2452_v61 }
  0xb0   :  { %v1683_v26 = vpop.permute.xlu0 %1682  ;;  %1430 = vmatprep.subr.bf16.mxu1 %v1429_v62  ;;  %v292_v29 = vsel %vm40_vm0, %v219_v3, %v245_v24 }
  0xb1   :  { %v1685_v52 = vunpack.i.h.bf16 %v1683_v26  ;;  %v1684_v9 = vunpack.i.l.bf16 %v1683_v26  ;;  %1432 = vmatpush1.bf16.msra.mxu1 %v1431_v12 }
  0xb2   :  { %v2464_v10 = vpop.permute.xlu1 %1697 }
  0xb3   :  { %v244_v63 = vsel %vm243_vm7, %v1684_v9, %v1674_v59  ;;  %v248_v28 = vsel %vm243_vm7, %v1685_v52, %v1689_v15  ;;  %v247_v32 = vsel %vm243_vm7, %v1690_v47, %v1685_v52  ;;  %v1700_v6 = vunpack.i.h.bf16 %v2464_v10 }
  0xb4   :  { %v2472_v5 = vpop.permute.xlu0 %1692  ;;  %v1411_v30 = vpack.c.bf16 %v248_v28, %v292_v29  ;;  %v291_v1 = vsel %vm40_vm0, %v218_v13, %v244_v63  ;;  %v1699_v39 = vunpack.i.l.bf16 %v2464_v10 }
  0xb5   :  { %v1413_v33 = vpack.c.bf16 %v247_v32, %v291_v1  ;;  %v1695_v44 = vunpack.i.h.bf16 %v2472_v5  ;;  %v1694_v46 = vunpack.i.l.bf16 %v2472_v5 }
  0xb6   :  { %v2476_v34 = vpop.permute.xlu1 %1707  ;;  %1412 = vmatprep.subr.bf16.mxu0 %v1411_v30  ;;  %v451_v37 = vsel %vm185_vm5, %v1699_v39, %v1700_v6 }
  0xb7   :  { %1414 = vmatpush1.bf16.msra.mxu0 %v1413_v33  ;;  %v1709_v50 = vunpack.i.l.bf16 %v2476_v34  ;;  %v426_v38 = vsel %vm156_vm4, %v1694_v46, %v1695_v44 }
  0xb8   :  { %v1703_v58 = vpop.permute.xlu0 %1702  ;;  %v550_v56 = vsel %vm40_vm0, %v426_v38, %v451_v37 }
  0xb9   :  { %v1704_v22 = vunpack.i.l.bf16 %v1703_v58  ;;  %v188_v12 = vsel %vm185_vm5, %v1605_v11, %v1709_v50  ;;  %v1705_v14 = vunpack.i.h.bf16 %v1703_v58 }
  0xba   :  { %v2483_v59 = vpop.permute.xlu1 %1717 }
  0xbb   :  { %v162_v62 = vsel %vm156_vm4, %v1600_v16, %v1704_v22  ;;  %v1720_v24 = vunpack.i.h.bf16 %v2483_v59  ;;  %v1719_v47 = vunpack.i.l.bf16 %v2483_v59 }
  0xbc   :  { %v2497_v23 = vpop.permute.xlu0 %1712  ;;  %v290_v16 = vsel %vm40_vm0, %v162_v62, %v188_v12 }
  0xbd   :  { %v1715_v26 = vunpack.i.h.bf16 %v2497_v23  ;;  %v1714_v52 = vunpack.i.l.bf16 %v2497_v23  ;;  %v274_v30 = vsel %vm272_vm8, %v1719_v47, %v1720_v24 }
  0xbe   :  { %v1728_v9 = vpop.permute.xlu1 %1727 }
  0xbf   :  { %v1730_v20 = vunpack.i.h.bf16 %v1728_v9  ;;  %v1729_v3 = vunpack.i.l.bf16 %v1728_v9  ;;  %v423_v11 = vsel %vm156_vm4, %v1705_v14, %v1714_v52  ;;  %v159_v13 = vsel %vm156_vm4, %v1610_v19, %v1715_v26  ;;  %v2542_v9 = vld [vmem:[%s2968_s1] sm:$0xff] }
  0xc0   :  { %v2511_v63 = vpop.permute.xlu0 %1722  ;;  %v1433_v28 = vpack.c.bf16 %v550_v56, %v423_v11  ;;  %v1435_v29 = vpack.c.bf16 %v290_v16, %v159_v13  ;;  %v1710_v56 = vunpack.i.h.bf16 %v2476_v34 }
  0xc1   :  { %v273_v32 = vsel %vm272_vm8, %v1729_v3, %v1719_v47  ;;  %v1725_v1 = vunpack.i.h.bf16 %v2511_v63  ;;  %v1724_v33 = vunpack.i.l.bf16 %v2511_v63 }
  0xc2   :  { %v2519_v39 = vpop.permute.xlu1 %1737  ;;  %1434 = vmatprep.subr.bf16.mxu1 %v1433_v28 }
  0xc3   :  { %v276_v18 = vsel %vm272_vm8, %v1730_v20, %v1724_v33  ;;  %v277_v19 = vsel %vm272_vm8, %v1724_v33, %v1725_v1  ;;  %1436 = vmatpush1.bf16.msra.mxu1 %v1435_v29  ;;  %v1739_v62 = vunpack.i.l.bf16 %v2519_v39  ;;  %v1740_v16 = vunpack.i.h.bf16 %v2519_v39 }
  0xc4   :  { %v1415_v50 = vpack.c.bf16 %v277_v19, %v274_v30  ;;  %v1418_v58 = vpack.c.bf16 %v276_v18, %v273_v32  ;;  %v1733_v22 = vpop.permute.xlu0 %1732 }
  0xc5   :  { %v1735_v37 = vunpack.i.h.bf16 %v1733_v22  ;;  %v1734_v38 = vunpack.i.l.bf16 %v1733_v22  ;;  %v191_v17 = vsel %vm185_vm5, %v1639_v8, %v1740_v16 }
  0xc6   :  { %v1748_v12 = vpop.permute.xlu1 %1747  ;;  %1417 = vmatprep.subr.msk.bf16.mxu0 %vm2526_vm10, %v1415_v50 }
  0xc7   :  { %v340_v14 = vsel %vm69_vm1, %v1590_v45, %v1734_v38  ;;  %v341_v47 = vsel %vm69_vm1, %v1734_v38, %v1735_v37  ;;  %v1749_v26 = vunpack.i.l.bf16 %v1748_v12  ;;  %1420 = vmatpush1.bf16.msk.msra.mxu0 %vm2526_vm10, %v1418_v58  ;;  %v1750_v34 = vunpack.i.h.bf16 %v1748_v12 }
  0xc8   :  { %v2546_v20 = vpop.permute.xlu0 %1742  ;;  %v546_v43 = vsel %vm40_vm0, %v2233_v55, %v341_v47  ;;  %v545_v45 = vsel %vm40_vm0, %v2150_v35, %v340_v14  ;;  %v454_v55 = vsel %vm185_vm5, %v1710_v56, %v1739_v62 }
  0xc9   :  { %v1745_v3 = vunpack.i.h.bf16 %v2546_v20  ;;  %v1744_v11 = vunpack.i.l.bf16 %v2546_v20  ;;  %v1451_v13 = vpack.c.bf16 %v546_v43, %v2208_v48  ;;  %v1453_v28 = vpack.c.bf16 %v545_v45, %v2105_v21 }
  0xca   :  { %v2556_v29 = vpop.permute.xlu1 %1757  ;;  %1381 = vmatmul.mubr.msk.f32.vlgmr.msra.gmra.mrb[0].mxu0 %vm185_vm5, %v2542_v9  ;;  %v217_v35 = vsel %vm214_vm6, %v1645_v25, %v1749_v26 }
  0xcb   :  { %v1760_v30 = vunpack.i.h.bf16 %v2556_v29  ;;  %v1759_v48 = vunpack.i.l.bf16 %v2556_v29  ;;  %1452 = vmatprep.subr.bf16.mxu0 %v1451_v13  ;;  %v479_v21 = vsel %vm214_vm6, %v1744_v11, %v1745_v3  ;;  %784 = vmatprep.mubr.f32.mxu0 %v2006_v53  ;;  %v1439_v18 = vpack.c.bf16 %v217_v35, %v191_v17 }
  0xcc   :  { %v2572_v32 = vpop.permute.xlu0 %1752  ;;  %1454 = vmatpush1.bf16.msra.mxu0 %v1453_v28  ;;  %v1437_v33 = vpack.c.bf16 %v479_v21, %v454_v55 }
  0xcd   :  { %v1754_v25 = vunpack.i.l.bf16 %v2572_v32  ;;  %v1755_v19 = vunpack.i.h.bf16 %v2572_v32  ;;  %v507_v58 = vsel %vm243_vm7, %v1759_v48, %v1760_v30 }
  0xce   :  { %v2579_v50 = vpop.permute.xlu1 %1767  ;;  %1438 = vmatprep.subr.bf16.mxu1 %v1437_v33 }
  0xcf   :  { %v482_v22 = vsel %vm214_vm6, %v1750_v34, %v1754_v25  ;;  %v1769_v54 = vunpack.i.l.bf16 %v2579_v50  ;;  %1440 = vmatpush1.bf16.msra.mxu1 %v1439_v18  ;;  %v1770_v8 = vunpack.i.h.bf16 %v2579_v50  ;;  %v220_v14 = vsel %vm214_vm6, %v1669_v60, %v1755_v19 }
  0xd0   :  { %v1763_v37 = vpop.permute.xlu0 %1762  ;;  %v553_v26 = vsel %vm40_vm0, %v482_v22, %v507_v58 }
  0xd1   :  { %v1765_v38 = vunpack.i.h.bf16 %v1763_v37  ;;  %v1764_v12 = vunpack.i.l.bf16 %v1763_v37  ;;  %v249_v31 = vsel %vm243_vm7, %v1689_v15, %v1770_v8 }
  0xd2   :  { %v1778_v47 = vpop.permute.xlu1 %1777 }
  0xd3   :  { %v246_v56 = vsel %vm243_vm7, %v1675_v41, %v1764_v12  ;;  %v1780_v16 = vunpack.i.h.bf16 %v1778_v47  ;;  %v1779_v43 = vunpack.i.l.bf16 %v1778_v47  ;;  %v510_v45 = vsel %vm243_vm7, %v1765_v38, %v1769_v54 }
  0xd4   :  { %v1773_v11 = vpop.permute.xlu0 %1772  ;;  %v1441_v13 = vpack.c.bf16 %v510_v45, %v553_v26  ;;  %v293_v60 = vsel %vm40_vm0, %v220_v14, %v246_v56 }
  0xd5   :  { %v1775_v28 = vunpack.i.h.bf16 %v1773_v11  ;;  %v1774_v55 = vunpack.i.l.bf16 %v1773_v11  ;;  %v1443_v35 = vpack.c.bf16 %v249_v31, %v293_v60  ;;  %v369_v41 = vsel %vm98_vm2, %v1779_v43, %v1780_v16 }
  0xd6   :  { %v1788_v57 = vpop.permute.xlu1 %1787  ;;  %1442 = vmatprep.subr.bf16.mxu1 %v1441_v13  ;;  %v368_v34 = vsel %vm98_vm2, %v1630_v2, %v1779_v43 }
  0xd7   :  { %v343_v48 = vsel %vm69_vm1, %v1624_v49, %v1774_v55  ;;  %1444 = vmatpush1.bf16.msra.mxu1 %v1443_v35  ;;  %v344_v61 = vsel %vm69_vm1, %v1774_v55, %v1775_v28  ;;  %v1790_v21 = vunpack.i.h.bf16 %v1788_v57  ;;  %v1789_v58 = vunpack.i.l.bf16 %v1788_v57 }
  0xd8   :  { %v1457_v15 = vpack.c.bf16 %v368_v34, %v343_v48  ;;  %v1783_v33 = vpop.permute.xlu0 %1782  ;;  %v1455_v17 = vpack.c.bf16 %v369_v41, %v344_v61 }
  0xd9   :  { %v1785_v18 = vunpack.i.h.bf16 %v1783_v33  ;;  %v1784_v19 = vunpack.i.l.bf16 %v1783_v33  ;;  %v397_v42 = vsel %vm127_vm3, %v1789_v58, %v1790_v21  ;;  %v396_v26 = vsel %vm127_vm3, %v1660_v4, %v1789_v58 }
  0xda   :  { %v2611_v22 = vpop.permute.xlu1 %1797  ;;  %1456 = vmatprep.subr.bf16.mxu0 %v1455_v17 }
  0xdb   :  { %v1800_v36 = vunpack.i.h.bf16 %v2611_v22  ;;  %v1799_v2 = vunpack.i.l.bf16 %v2611_v22  ;;  %1458 = vmatpush1.bf16.msra.mxu0 %v1457_v15  ;;  %v371_v49 = vsel %vm98_vm2, %v1654_v7, %v1784_v19  ;;  %v372_v37 = vsel %vm98_vm2, %v1784_v19, %v1785_v18  ;;  %v23_v22 = vld [vmem:[%s2969_s5] sm:$0x3f] }
  0xdc   :  { %v2619_v8 = vpop.permute.xlu0 %1792  ;;  %v548_v43 = vsel %vm40_vm0, %v371_v49, %v396_v26  ;;  %v549_v11 = vsel %vm40_vm0, %v372_v37, %v397_v42 }
  0xdd   :  { %v538_v38 = vsel %vm272_vm8, %v1799_v2, %v1800_v36  ;;  %v1795_v12 = vunpack.i.h.bf16 %v2619_v8  ;;  %v1794_v14 = vunpack.i.l.bf16 %v2619_v8  ;;  %v798_v8 = vlaneseq }
  0xde   :  { %v1808_v47 = vpop.permute.xlu1 %1807 }
  0xdf   :  { %v535_v0 = vsel %vm272_vm8, %v1794_v14, %v1795_v12  ;;  %v1810_v7 = vunpack.i.h.bf16 %v1808_v47  ;;  %v1809_v56 = vunpack.i.l.bf16 %v1808_v47 }
  0xe0   :  { %v1445_v16 = vpack.c.bf16 %v538_v38, %v535_v0  ;;  %v1803_v45 = vpop.permute.xlu0 %1802 }
  0xe1   :  { %v399_v13 = vsel %vm127_vm3, %v1679_v51, %v1809_v56  ;;  %v1805_v31 = vunpack.i.h.bf16 %v1803_v45  ;;  %v1804_v27 = vunpack.i.l.bf16 %v1803_v45  ;;  %v400_v4 = vsel %vm127_vm3, %v1809_v56, %v1810_v7 }
  0xe2   :  { %v1461_v60 = vpack.c.bf16 %v399_v13, %v548_v43  ;;  %v1818_v28 = vpop.permute.xlu1 %1817  ;;  %1447 = vmatprep.subr.msk.bf16.mxu1 %vm2526_vm10, %v1445_v16  ;;  %v1459_v55 = vpack.c.bf16 %v400_v4, %v549_v11 }
  0xe3   :  { %v275_v35 = vsel %vm272_vm8, %v1720_v24, %v1804_v27  ;;  %v278_v40 = vsel %vm272_vm8, %v1725_v1, %v1805_v31  ;;  %v1820_v57 = vunpack.i.h.bf16 %v1818_v28  ;;  %v1819_v41 = vunpack.i.l.bf16 %v1818_v28 }
  0xe4   :  { %v1448_v51 = vpack.c.bf16 %v278_v40, %v275_v35  ;;  %v1813_v34 = vpop.permute.xlu0 %1812  ;;  %1460 = vmatprep.subr.bf16.mxu0 %v1459_v55 }
  0xe5   :  { %v1815_v48 = vunpack.i.h.bf16 %v1813_v34  ;;  %v1814_v61 = vunpack.i.l.bf16 %v1813_v34  ;;  %1462 = vmatpush1.bf16.msra.mxu0 %v1461_v60  ;;  %v453_v15 = vsel %vm185_vm5, %v1819_v41, %v1820_v57  ;;  %v452_v19 = vsel %vm185_vm5, %v1700_v6, %v1819_v41 }
  0xe6   :  { %v1828_v21 = vpop.permute.xlu1 %1827  ;;  %1450 = vmatpush1.bf16.msk.msra.mxu1 %vm2526_vm10, %v1448_v51 }
  0xe7   :  { %v428_v59 = vsel %vm156_vm4, %v1814_v61, %v1815_v48  ;;  %v427_v24 = vsel %vm156_vm4, %v1695_v44, %v1814_v61  ;;  %v1830_v1 = vunpack.i.h.bf16 %v1828_v21  ;;  %v1829_v2 = vunpack.i.l.bf16 %v1828_v21 }
  0xe8   :  { %v1823_v63 = vpop.permute.xlu0 %1822  ;;  %v552_v18 = vsel %vm40_vm0, %v428_v59, %v453_v15  ;;  %v551_v44 = vsel %vm40_vm0, %v427_v24, %v452_v19 }
  0xe9   :  { %v1825_v33 = vunpack.i.h.bf16 %v1823_v63  ;;  %v1824_v17 = vunpack.i.l.bf16 %v1823_v63  ;;  %1384 = vmatmul.mubr.msk.f32.vlgmr.msra.gmra.mrb[0].mxu1 %vm185_vm5, %v2542_v9  ;;  %v456_v6 = vsel %vm185_vm5, %v1829_v2, %v1830_v1  ;;  %v455_v23 = vsel %vm185_vm5, %v1739_v62, %v1829_v2 }
  0xea   :  { %v1838_v58 = vpop.permute.xlu1 %1837  ;;  %1197 = vmatprep.mubr.f32.mxu1 %v2006_v53 }
  0xeb   :  { %v424_v5 = vsel %vm156_vm4, %v1714_v52, %v1824_v17  ;;  %v425_v42 = vsel %vm156_vm4, %v1824_v17, %v1825_v33  ;;  %v1840_v14 = vunpack.i.h.bf16 %v1838_v58  ;;  %v1839_v26 = vunpack.i.l.bf16 %v1838_v58 }
  0xec   :  { %v1465_v49 = vpack.c.bf16 %v551_v44, %v424_v5  ;;  %v1833_v37 = vpop.permute.xlu0 %1832  ;;  %v1463_v38 = vpack.c.bf16 %v552_v18, %v425_v42 }
  0xed   :  { %v1835_v47 = vunpack.i.h.bf16 %v1833_v37  ;;  %v1834_v10 = vunpack.i.l.bf16 %v1833_v37  ;;  %v484_v13 = vsel %vm214_vm6, %v1839_v26, %v1840_v14  ;;  %v483_v39 = vsel %vm214_vm6, %v1754_v25, %v1839_v26 }
  0xee   :  { %v1848_v0 = vpop.permute.xlu1 %1847  ;;  %1464 = vmatprep.subr.bf16.mxu0 %v1463_v38 }
  0xef   :  { %v480_v52 = vsel %vm214_vm6, %v1745_v3, %v1834_v10  ;;  %v1850_v7 = vunpack.i.h.bf16 %v1848_v0  ;;  %1466 = vmatpush1.bf16.msra.mxu0 %v1465_v49  ;;  %v481_v56 = vsel %vm214_vm6, %v1834_v10, %v1835_v47  ;;  %v1849_v43 = vunpack.i.l.bf16 %v1848_v0 }
  0xf0   :  { %v1469_v16 = vpack.c.bf16 %v480_v52, %v455_v23  ;;  %v1843_v45 = vpop.permute.xlu0 %1842  ;;  %v1467_v11 = vpack.c.bf16 %v481_v56, %v456_v6 }
  0xf1   :  { %v1845_v31 = vunpack.i.h.bf16 %v1843_v45  ;;  %v1844_v27 = vunpack.i.l.bf16 %v1843_v45  ;;  %v512_v20 = vsel %vm243_vm7, %v1849_v43, %v1850_v7  ;;  %v511_v25 = vsel %vm243_vm7, %v1769_v54, %v1849_v43 }
  0xf2   :  { %v1858_v62 = vpop.permute.xlu1 %1857  ;;  %1468 = vmatprep.subr.bf16.mxu0 %v1467_v11 }
  0xf3   :  { %v508_v3 = vsel %vm243_vm7, %v1760_v30, %v1844_v27  ;;  %v509_v4 = vsel %vm243_vm7, %v1844_v27, %v1845_v31  ;;  %v1860_v60 = vunpack.i.h.bf16 %v1858_v62  ;;  %v1859_v28 = vunpack.i.l.bf16 %v1858_v62  ;;  %1470 = vmatpush1.bf16.msra.mxu0 %v1469_v16 }
  0xf4   :  { %v1853_v55 = vpop.permute.xlu0 %1852  ;;  %v555_v35 = vsel %vm40_vm0, %v484_v13, %v509_v4  ;;  %v554_v32 = vsel %vm40_vm0, %v483_v39, %v508_v3 }
  0xf5   :  { %v540_v40 = vsel %vm272_vm8, %v1859_v28, %v1860_v60  ;;  %v1855_v57 = vunpack.i.h.bf16 %v1853_v55  ;;  %v1854_v29 = vunpack.i.l.bf16 %v1853_v55  ;;  %v1471_v51 = vpack.c.bf16 %v512_v20, %v555_v35 }
  0xf6   :  { %v1473_v30 = vpack.c.bf16 %v511_v25, %v554_v32  ;;  %v539_v50 = vsel %vm272_vm8, %v1800_v36, %v1859_v28 }
  0xf7   :  { %v537_v41 = vsel %vm272_vm8, %v1854_v29, %v1855_v57  ;;  %v536_v34 = vsel %vm272_vm8, %v1795_v12, %v1854_v29  ;;  %1472 = vmatprep.subr.bf16.mxu0 %v1471_v51  ;;  %v799_v12 = vshrl.u32 %v798_v8, 7 }
  0xf8   :  { %v1475_v48 = vpack.c.bf16 %v540_v40, %v537_v41  ;;  %1474 = vmatpush1.bf16.msra.mxu0 %v1473_v30  ;;  %v1478_v54 = vpack.c.bf16 %v539_v50, %v536_v34 }
  0xf9   :  { %v800_v61 = vsub.s32 0, %v799_v12  ;;  %v804_v36 = vsub.s32 1, %v799_v12  ;;  %v808_v19 = vsub.s32 2, %v799_v12  ;;  %v812_v58 = vsub.s32 3, %v799_v12 }
  0xfa   :  { %1477 = vmatprep.subr.msk.bf16.mxu0 %vm2526_vm10, %v1475_v48  ;;  %v816_v6 = vsub.s32 4, %v799_v12  ;;  %v820_v26 = vsub.s32 5, %v799_v12  ;;  %v1123_v48 = vld [vmem:[%s2970_s4] sm:$0xf] }
  0xfb   :  { %v801_v24 = vrot.slane %v23_v22, %v800_v61  ;;  %v805_v33 = vrot.slane %v23_v22, %v804_v36  ;;  %v809_v44 = vrot.slane %v23_v22, %v808_v19  ;;  %v813_v37 = vrot.slane %v23_v22, %v812_v58 }
  0xfc   :  { %1480 = vmatpush1.bf16.msk.msra.mxu0 %vm2526_vm10, %v1478_v54  ;;  %v817_v52 = vrot.slane %v23_v22, %v816_v6  ;;  %v821_v16 = vrot.slane %v23_v22, %v820_v26 }
  0xff   :  { %1387 = vmatmul.mubr.msk.f32.vlgmr.msra.gmra.mrb[2].mxu0 %vm185_vm5, %v2542_v9 }
 0x100   :  { %1339 = vmatprep.mubr.f32.mxu0 %v2006_v53 }
 0x105   :  { %v561_v15 = vpop.permute.xlu0 %560 }
 0x19d   :  { %v644_v21 = vpop.f32.mrb[0].mxu0 }
 0x19e   :  { %v645_v59 = vadd.f32 %v644_v21, %v561_v15  ;;  %v646_v63 = vpop.f32.mrb[1].mxu0 }
 0x19f   :  { %v647_v46 = vadd.f32 %v646_v63, %v561_v15 }
 0x1a0   :  { %v791_v1 = vmax.f32 %v645_v59, 0.0 }
 0x1a1   :  { %v792_v17 = vmax.f32 %v647_v46, 0.0 }
 0x1a2   :  { %v828_v9 = vmul.f32 %v801_v24, %v791_v1 }
 0x1a3   :  { %v829_v18 = vmul.f32 %v805_v33, %v792_v17 }
 0x1a4   :  { %845 = vrot.lane.b32.xlu1 %v828_v9, %s2009_s18 }
 0x1a8   :  { %847 = vrot.lane.b32.xlu1 %v829_v18, %s2009_s18 }
 0x1bc   :  { %v715_v2 = vpop.f32.mrb[0].mxu1 }
 0x1bd   :  { %v716_v5 = vadd.f32 %v715_v2, %v561_v15  ;;  %v717_v42 = vpop.f32.mrb[1].mxu1 }
 0x1be   :  { %v718_v49 = vadd.f32 %v717_v42, %v561_v15 }
 0x1bf   :  { %v793_v38 = vmax.f32 %v716_v5, 0.0 }
 0x1c0   :  { %v794_v14 = vmax.f32 %v718_v49, 0.0 }
 0x1c1   :  { %v830_v47 = vmul.f32 %v809_v44, %v793_v38 }
 0x1c2   :  { %v831_v10 = vmul.f32 %v813_v37, %v794_v14 }
 0x1c3   :  { %849 = vrot.lane.b32.xlu0 %v830_v47, %s2009_s18 }
 0x1c4   :  { %866 = vrot.lane.b32.xlu1 %v831_v10, %s2009_s18 }
 0x1d2   :  { %v786_v0 = vpop.f32.mrb[2].mxu0 }
 0x1d3   :  { %v787_v23 = vadd.f32 %v786_v0, %v561_v15  ;;  %v788_v7 = vpop.f32.mrb[3].mxu0 }
 0x1d4   :  { %v789_v56 = vadd.f32 %v788_v7, %v561_v15 }
 0x1d5   :  { %v795_v43 = vmax.f32 %v787_v23, 0.0 }
 0x1d6   :  { %v796_v45 = vmax.f32 %v789_v56, 0.0 }
 0x1d7   :  { %v832_v11 = vmul.f32 %v817_v52, %v795_v43 }
 0x1d8   :  { %v833_v13 = vmul.f32 %v821_v16, %v796_v45 }
 0x1d9   :  { %868 = vrot.lane.b32.xlu0 %v832_v11, %s2009_s18 }
 0x1da   :  { %870 = vrot.lane.b32.xlu1 %v833_v13, %s2009_s18 }
 0x216   :  { %v846_v31 = vpop.permute.xlu1 %845 }
 0x217   :  { %859 = vst.msk [vmem:[#allocation2] sm:$0xff] %vm858_vm11, %v846_v31 }
 0x21a   :  { %v848_v27 = vpop.permute.xlu1 %847 }
 0x21b   :  { %v2707_v39 = vsel %vm851_vm12, %v846_v31, %v848_v27 }
 0x21e   :  { %v2709_v62 = vld [vmem:[#allocation2] sm:$0xff] }
 0x21f   :  { %992 = vrot.lane.b32.xlu0 %v2709_v62, %s2005_s8  ;;  %978 = vrot.lane.b32.xlu1 %v2709_v62, %s2004_s27 }
 0x235   :  { %v850_v20 = vpop.permute.xlu0 %849 }
 0x236   :  { %v2716_v3 = vsel %vm851_vm12, %v848_v27, %v850_v20  ;;  %862 = vst.msk [vmem:[#allocation2 + $0x18] sm:$0xff] %vm851_vm12, %v850_v20  ;;  %v867_v4 = vpop.permute.xlu1 %866 }
 0x237   :  { %878 = vst.msk [vmem:[#allocation2 + $0x20] sm:$0xff] %vm858_vm11, %v867_v4  ;;  %v1892_v55 = vpack.i.bf16 %v2716_v3, %v2707_v39 }
 0x23d   :  { %v885_v29 = vld [vmem:[#allocation2 + $0x18] sm:$0xff] }
 0x23e   :  { %v2719_v60 = vld [vmem:[#allocation2 + $0x20] sm:$0xff] }
 0x23f   :  { %v1867_v28 = vpack.i.bf16 %v2719_v60, %v2709_v62 }
 0x241   :  { %1868 = vrot.lane.b32.xlu0 %v1867_v28, %s1998_s9  ;;  %1863 = vrot.lane.b32.xlu1 %v1867_v28, %s1999_s10 }
 0x245   :  { %1878 = vrot.lane.b32.xlu0 %v1867_v28, %s2001_s22  ;;  %1873 = vrot.lane.b32.xlu1 %v1867_v28, %s2000_s19 }
 0x249   :  { %1888 = vrot.lane.b32.xlu0 %v1867_v28, %s2003_s26  ;;  %1883 = vrot.lane.b32.xlu1 %v1867_v28, %s2002_s25 }
 0x24b   :  { %v869_v35 = vpop.permute.xlu0 %868 }
 0x24c   :  { %v2732_v32 = vsel %vm851_vm12, %v867_v4, %v869_v35  ;;  %v871_v25 = vpop.permute.xlu1 %870 }
 0x24d   :  { %1893 = vrot.lane.b32.xlu0 %v1892_v55, %s1999_s10  ;;  %1903 = vrot.lane.b32.xlu1 %v1892_v55, %s2000_s19  ;;  %v2737_v40 = vsel %vm851_vm12, %v869_v35, %v871_v25  ;;  %881 = vst.msk [vmem:[#allocation2 + $0x38] sm:$0xff] %vm851_vm12, %v871_v25  ;;  %v1962_v30 = vpack.i.bf16 %v2732_v32, %v2719_v60 }
 0x24e   :  { %v1967_v41 = vpack.i.bf16 %v2737_v40, %v2732_v32 }
 0x251   :  { %1898 = vrot.lane.b32.xlu0 %v1892_v55, %s1998_s9  ;;  %1913 = vrot.lane.b32.xlu1 %v1892_v55, %s2002_s25 }
 0x254   :  { %v889_v57 = vld [vmem:[#allocation2 + $0x38] sm:$0xff] }
 0x255   :  { %1908 = vrot.lane.b32.xlu0 %v1892_v55, %s2001_s22  ;;  %1923 = vrot.lane.b32.xlu1 %v1892_v55, %s2004_s27  ;;  %v1927_v51 = vpack.i.bf16 %v885_v29, %v889_v57  ;;  %v1992_v34 = vpack.i.bf16 %v889_v57, %v2737_v40 }
 0x259   :  { %1918 = vrot.lane.b32.xlu0 %v1892_v55, %s2003_s26  ;;  %996 = vrot.lane.b32.xlu1 %v2716_v3, %s2005_s8 }
 0x25d   :  { %994 = vrot.lane.b32.xlu0 %v2707_v39, %s2005_s8  ;;  %1928 = vrot.lane.b32.xlu1 %v1927_v51, %s1999_s10 }
 0x261   :  { %1933 = vrot.lane.b32.xlu0 %v1927_v51, %s1998_s9  ;;  %1963 = vrot.lane.b32.xlu1 %v1962_v30, %s2004_s27 }
 0x265   :  { %1938 = vrot.lane.b32.xlu0 %v1927_v51, %s2000_s19  ;;  %984 = vrot.lane.b32.xlu1 %v885_v29, %s2004_s27 }
 0x269   :  { %1943 = vrot.lane.b32.xlu0 %v1927_v51, %s2001_s22  ;;  %1968 = vrot.lane.b32.xlu1 %v1967_v41, %s1998_s9 }
 0x26d   :  { %1948 = vrot.lane.b32.xlu0 %v1927_v51, %s2002_s25  ;;  %1973 = vrot.lane.b32.xlu1 %v1967_v41, %s2000_s19 }
 0x271   :  { %1978 = vrot.lane.b32.xlu1 %v1967_v41, %s2001_s22  ;;  %1953 = vrot.lane.b32.xlu0 %v1967_v41, %s1999_s10 }
 0x275   :  { %1983 = vrot.lane.b32.xlu1 %v1967_v41, %s2002_s25  ;;  %1958 = vrot.lane.b32.xlu0 %v1927_v51, %s2003_s26 }
 0x279   :  { %1988 = vrot.lane.b32.xlu1 %v1967_v41, %s2003_s26  ;;  %1108 = vrot.lane.b32.xlu0 %v2719_v60, %s2005_s8 }
 0x27d   :  { %1110 = vrot.lane.b32.xlu1 %v2732_v32, %s2005_s8  ;;  %1993 = vrot.lane.b32.xlu0 %v1992_v34, %s2004_s27 }
 0x281   :  { %1114 = vrot.lane.b32.xlu1 %v889_v57, %s2005_s8  ;;  %1112 = vrot.lane.b32.xlu0 %v2737_v40, %s2005_s8 }
 0x285   :  { %998 = vrot.lane.b32.xlu0 %v885_v29, %s2005_s8  ;;  %1126 = vperm.xlu1 %1997, %v1123_v48  }
 0x291   :  { %v2780_v50 = vpop.permute.xlu0 %992  ;;  %v979_v54 = vpop.permute.xlu1 %978 }
 0x2b3   :  { %v2782_v8 = vpop.permute.xlu0 %1868  ;;  %v2784_v12 = vpop.permute.xlu1 %1863 }
 0x2b4   :  { %v1865_v24 = vunpack.i.l.bf16 %v2784_v12  ;;  %v1870_v5 = vunpack.i.l.bf16 %v2782_v8 }
 0x2b7   :  { %v2786_v61 = vpop.permute.xlu0 %1878  ;;  %v2788_v15 = vpop.permute.xlu1 %1873 }
 0x2b8   :  { %v1875_v44 = vunpack.i.l.bf16 %v2788_v15  ;;  %v1880_v56 = vunpack.i.l.bf16 %v2786_v61 }
 0x2bb   :  { %v2790_v22 = vpop.permute.xlu0 %1888  ;;  %v2792_v36 = vpop.permute.xlu1 %1883 }
 0x2bc   :  { %v1885_v26 = vunpack.i.l.bf16 %v2792_v36  ;;  %v1890_v55 = vunpack.i.l.bf16 %v2790_v22 }
 0x2bf   :  { %v2794_v21 = vpop.permute.xlu0 %1893  ;;  %v2796_v59 = vpop.permute.xlu1 %1903 }
 0x2c0   :  { %v1896_v63 = vunpack.i.h.bf16 %v2794_v21  ;;  %v1895_v46 = vunpack.i.l.bf16 %v2794_v21  ;;  %v1906_v33 = vunpack.i.h.bf16 %v2796_v59  ;;  %v1905_v17 = vunpack.i.l.bf16 %v2796_v59 }
 0x2c2   :  { %v902_v1 = vsel %vm69_vm1, %v1865_v24, %v1895_v46  ;;  %v903_v9 = vsel %vm69_vm1, %v1895_v46, %v1896_v63  ;;  %v930_v14 = vsel %vm127_vm3, %v1875_v44, %v1905_v17  ;;  %v931_v6 = vsel %vm127_vm3, %v1905_v17, %v1906_v33  ;;  %v2867_v17 = vld [vmem:[%s2971_s3] sm:$0xf] }
 0x2c3   :  { %v1483_v18 = vpack.c.bf16 %v902_v1, %v2709_v62  ;;  %v2808_v19 = vpop.permute.xlu0 %1898  ;;  %v2810_v58 = vpop.permute.xlu1 %1913  ;;  %v1481_v2 = vpack.c.bf16 %v903_v9, %v2707_v39 }
 0x2c4   :  { %v1901_v42 = vunpack.i.h.bf16 %v2808_v19  ;;  %v1900_v49 = vunpack.i.l.bf16 %v2808_v19  ;;  %v1916_v37 = vunpack.i.h.bf16 %v2810_v58  ;;  %v1915_v38 = vunpack.i.l.bf16 %v2810_v58 }
 0x2c5   :  { %1482 = vmatprep.subr.bf16.mxu1 %v1481_v2 }
 0x2c6   :  { %v916_v47 = vsel %vm98_vm2, %v1870_v5, %v1900_v49  ;;  %1484 = vmatpush1.bf16.msra.mxu1 %v1483_v18  ;;  %v917_v10 = vsel %vm98_vm2, %v1900_v49, %v1901_v42  ;;  %v958_v45 = vsel %vm185_vm5, %v1885_v26, %v1915_v38  ;;  %v959_v11 = vsel %vm185_vm5, %v1915_v38, %v1916_v37 }
 0x2c7   :  { %v1487_v0 = vpack.c.bf16 %v930_v14, %v916_v47  ;;  %v2828_v23 = vpop.permute.xlu0 %1908  ;;  %v2830_v52 = vpop.permute.xlu1 %1923  ;;  %v1485_v7 = vpack.c.bf16 %v931_v6, %v917_v10  ;;  %v1871_v38 = vunpack.i.h.bf16 %v2782_v8  ;;  %v1881_v6 = vunpack.i.h.bf16 %v2786_v61 }
 0x2c8   :  { %v1911_v16 = vunpack.i.h.bf16 %v2828_v23  ;;  %v1910_v43 = vunpack.i.l.bf16 %v2828_v23  ;;  %v1926_v31 = vunpack.i.h.bf16 %v2830_v52  ;;  %v1925_v27 = vunpack.i.l.bf16 %v2830_v52 }
 0x2c9   :  { %1486 = vmatprep.subr.bf16.mxu1 %v1485_v7  ;;  %v1891_v8 = vunpack.i.h.bf16 %v2790_v22 }
 0x2ca   :  { %v944_v13 = vsel %vm156_vm4, %v1880_v56, %v1910_v43  ;;  %1488 = vmatpush1.bf16.msra.mxu1 %v1487_v0  ;;  %v945_v39 = vsel %vm156_vm4, %v1910_v43, %v1911_v16  ;;  %v986_v57 = vsel %vm243_vm7, %v979_v54, %v1925_v27  ;;  %v987_v30 = vsel %vm243_vm7, %v1925_v27, %v1926_v31 }
 0x2cb   :  { %v1491_v62 = vpack.c.bf16 %v958_v45, %v944_v13  ;;  %v2845_v20 = vpop.permute.xlu0 %1918  ;;  %v2847_v4 = vpop.permute.xlu1 %996  ;;  %v1489_v28 = vpack.c.bf16 %v959_v11, %v945_v39  ;;  %v1886_v45 = vunpack.i.h.bf16 %v2792_v36 }
 0x2cc   :  { %v1921_v35 = vunpack.i.h.bf16 %v2845_v20  ;;  %v1920_v25 = vunpack.i.l.bf16 %v2845_v20 }
 0x2cd   :  { %1490 = vmatprep.subr.bf16.mxu1 %v1489_v28 }
 0x2ce   :  { %v972_v29 = vsel %vm214_vm6, %v1890_v55, %v1920_v25  ;;  %1492 = vmatpush1.bf16.msra.mxu1 %v1491_v62  ;;  %v973_v51 = vsel %vm214_vm6, %v1920_v25, %v1921_v35 }
 0x2cf   :  { %v1495_v41 = vpack.c.bf16 %v986_v57, %v972_v29  ;;  %v995_v34 = vpop.permute.xlu0 %994  ;;  %v1929_v48 = vpop.permute.xlu1 %1928  ;;  %v1493_v24 = vpack.c.bf16 %v987_v30, %v973_v51 }
 0x2d0   :  { %v1001_v54 = vsel %vm272_vm8, %v995_v34, %v2847_v4  ;;  %v1000_v9 = vsel %vm272_vm8, %v2780_v50, %v995_v34  ;;  %v1931_v49 = vunpack.i.h.bf16 %v1929_v48  ;;  %v1866_v50 = vunpack.i.h.bf16 %v2784_v12 }
 0x2d1   :  { %1494 = vmatprep.subr.bf16.mxu1 %v1493_v24  ;;  %v1930_v11 = vunpack.i.l.bf16 %v1929_v48 }
 0x2d2   :  { %1496 = vmatpush1.bf16.msra.mxu1 %v1495_v41  ;;  %v904_v26 = vsel %vm69_vm1, %v1896_v63, %v1931_v49 }
 0x2d3   :  { %v1934_v46 = vpop.permute.xlu0 %1933  ;;  %v2862_v1 = vpop.permute.xlu1 %1963  ;;  %1149 = vmatprep.subr.mxu1 %v1001_v54  ;;  %v1499_v12 = vpack.c.bf16 %v904_v26, %v2716_v3 }
 0x2d4   :  { %v1936_v14 = vunpack.i.h.bf16 %v1934_v46  ;;  %v1935_v21 = vunpack.i.l.bf16 %v1934_v46  ;;  %v1966_v63 = vunpack.i.h.bf16 %v2862_v1 }
 0x2d6   :  { %1150 = vmatpush1.msra.mxu1 %v1000_v9  ;;  %v918_v61 = vsel %vm98_vm2, %v1901_v42, %v1936_v14 }
 0x2d7   :  { %v1939_v18 = vpop.permute.xlu0 %1938  ;;  %v2871_v2 = vpop.permute.xlu1 %984  ;;  %1388 = vmatmul.mubr.msk.f32.vlgmr.msra.gmra.mrb[2].mxu1 %vm1129_vm13, %v2867_v17 }
 0x2d8   :  { %1268 = vmatprep.mubr.f32.mxu1 %v2006_v53  ;;  %v1941_v0 = vunpack.i.h.bf16 %v1939_v18  ;;  %v1876_v53 = vunpack.i.h.bf16 %v2788_v15  ;;  %v1940_v39 = vunpack.i.l.bf16 %v1939_v18  ;;  %v988_v20 = vsel %vm243_vm7, %v1926_v31, %v2871_v2 }
 0x2da   :  { %v932_v62 = vsel %vm127_vm3, %v1906_v33, %v1941_v0 }
 0x2db   :  { %v2876_v5 = vpop.permute.xlu0 %1943  ;;  %v1969_v44 = vpop.permute.xlu1 %1968  ;;  %v1503_v18 = vpack.c.bf16 %v932_v62, %v918_v61 }
 0x2dc   :  { %v1971_v7 = vunpack.i.h.bf16 %v1969_v44  ;;  %v1970_v56 = vunpack.i.l.bf16 %v1969_v44  ;;  %v1946_v44 = vunpack.i.h.bf16 %v2876_v5 }
 0x2de   :  { %v1032_v3 = vsel %vm98_vm2, %v1871_v38, %v1970_v56  ;;  %v1034_v42 = vsel %vm98_vm2, %v1971_v7, %v1935_v21  ;;  %v1033_v14 = vsel %vm98_vm2, %v1970_v56, %v1971_v7 }
 0x2df   :  { %v2879_v47 = vpop.permute.xlu0 %1948  ;;  %v1974_v10 = vpop.permute.xlu1 %1973 }
 0x2e0   :  { %v1975_v43 = vunpack.i.l.bf16 %v1974_v10  ;;  %v1976_v13 = vunpack.i.h.bf16 %v1974_v10  ;;  %v1951_v55 = vunpack.i.h.bf16 %v2879_v47  ;;  %v1965_v10 = vunpack.i.l.bf16 %v2862_v1 }
 0x2e2   :  { %v1046_v19 = vsel %vm127_vm3, %v1876_v53, %v1975_v43  ;;  %v1048_v59 = vsel %vm127_vm3, %v1976_v13, %v1940_v39  ;;  %v1047_v24 = vsel %vm127_vm3, %v1975_v43, %v1976_v13 }
 0x2e3   :  { %v1954_v27 = vpop.permute.xlu0 %1953  ;;  %v1979_v15 = vpop.permute.xlu1 %1978  ;;  %v1501_v49 = vpack.c.bf16 %v1046_v19, %v1032_v3  ;;  %v1517_v38 = vpack.c.bf16 %v1048_v59, %v1034_v42  ;;  %v1519_v26 = vpack.c.bf16 %v1047_v24, %v1033_v14 }
 0x2e4   :  { %v1956_v28 = vunpack.i.h.bf16 %v1954_v27  ;;  %v1955_v36 = vunpack.i.l.bf16 %v1954_v27  ;;  %v1980_v51 = vunpack.i.l.bf16 %v1979_v15  ;;  %v1981_v54 = vunpack.i.h.bf16 %v1979_v15 }
 0x2e5   :  { %v1102_v15 = vsel %vm243_vm7, %v1965_v10, %v1966_v63 }
 0x2e6   :  { %v1019_v25 = vsel %vm69_vm1, %v1955_v36, %v1956_v28  ;;  %v1018_v57 = vsel %vm69_vm1, %v1866_v50, %v1955_v36  ;;  %v1020_v29 = vsel %vm69_vm1, %v1956_v28, %v1930_v11  ;;  %v960_v50 = vsel %vm185_vm5, %v1916_v37, %v1951_v55 }
 0x2e7   :  { %v1515_v33 = vpack.c.bf16 %v1019_v25, %v2732_v32  ;;  %v1959_v30 = vpop.permute.xlu0 %1958  ;;  %v1984_v41 = vpop.permute.xlu1 %1983  ;;  %v1497_v34 = vpack.c.bf16 %v1018_v57, %v2719_v60  ;;  %v1513_v48 = vpack.c.bf16 %v1020_v29, %v2737_v40  ;;  %v1945_v32 = vunpack.i.l.bf16 %v2876_v5 }
 0x2e8   :  { %v1986_v46 = vunpack.i.h.bf16 %v1984_v41  ;;  %v1985_v9 = vunpack.i.l.bf16 %v1984_v41  ;;  %v1950_v60 = vunpack.i.l.bf16 %v2879_v47  ;;  %v1060_v5 = vsel %vm156_vm4, %v1881_v6, %v1980_v51 }
 0x2e9   :  { %1498 = vmatprep.subr.bf16.mxu1 %v1497_v34  ;;  %1514 = vmatprep.subr.bf16.mxu0 %v1513_v48  ;;  %v1961_v7 = vunpack.i.h.bf16 %v1959_v30  ;;  %v1062_v47 = vsel %vm156_vm4, %v1981_v54, %v1945_v32  ;;  %v946_v37 = vsel %vm156_vm4, %v1911_v16, %v1946_v44  ;;  %v1061_v61 = vsel %vm156_vm4, %v1980_v51, %v1981_v54 }
 0x2ea   :  { %1500 = vmatpush1.bf16.msra.mxu1 %v1499_v12  ;;  %1516 = vmatpush1.bf16.msra.mxu0 %v1515_v33  ;;  %v1074_v40 = vsel %vm185_vm5, %v1886_v45, %v1985_v9  ;;  %v1076_v43 = vsel %vm185_vm5, %v1986_v46, %v1950_v60  ;;  %v1075_v45 = vsel %vm185_vm5, %v1985_v9, %v1986_v46  ;;  %v1960_v23 = vunpack.i.l.bf16 %v1959_v30 }
 0x2eb   :  { %v1109_v0 = vpop.permute.xlu0 %1108  ;;  %v1989_v53 = vpop.permute.xlu1 %1988  ;;  %1502 = vmatprep.subr.bf16.mxu1 %v1501_v49  ;;  %1518 = vmatprep.subr.bf16.mxu0 %v1517_v38  ;;  %v1505_v13 = vpack.c.bf16 %v1074_v40, %v1060_v5  ;;  %v1521_v58 = vpack.c.bf16 %v1076_v43, %v1062_v47  ;;  %v1507_v12 = vpack.c.bf16 %v960_v50, %v946_v37 }
 0x2ec   :  { %v1990_v56 = vunpack.i.l.bf16 %v1989_v53  ;;  %v1991_v11 = vunpack.i.h.bf16 %v1989_v53  ;;  %v1523_v39 = vpack.c.bf16 %v1075_v45, %v1061_v61  ;;  %v974_v22 = vsel %vm214_vm6, %v1921_v35, %v1961_v7 }
 0x2ed   :  { %v1511_v57 = vpack.c.bf16 %v988_v20, %v974_v22 }
 0x2ee   :  { %1504 = vmatpush1.bf16.msra.mxu1 %v1503_v18  ;;  %1520 = vmatpush1.bf16.msra.mxu0 %v1519_v26  ;;  %v1088_v6 = vsel %vm214_vm6, %v1891_v8, %v1990_v56  ;;  %v1089_v8 = vsel %vm214_vm6, %v1990_v56, %v1991_v11  ;;  %v1090_v55 = vsel %vm214_vm6, %v1991_v11, %v1960_v23 }
 0x2ef   :  { %v1994_v21 = vpop.permute.xlu0 %1993  ;;  %v1111_v27 = vpop.permute.xlu1 %1110  ;;  %1506 = vmatprep.subr.bf16.mxu1 %v1505_v13  ;;  %1522 = vmatprep.subr.bf16.mxu0 %v1521_v58  ;;  %v1509_v28 = vpack.c.bf16 %v1102_v15, %v1088_v6 }
 0x2f0   :  { %v1996_v16 = vunpack.i.h.bf16 %v1994_v21  ;;  %v1995_v62 = vunpack.i.l.bf16 %v1994_v21  ;;  %v1116_v1 = vsel %vm272_vm8, %v1109_v0, %v1111_v27 }
 0x2f2   :  { %v1103_v36 = vsel %vm243_vm7, %v1966_v63, %v1995_v62  ;;  %1508 = vmatpush1.bf16.msra.mxu1 %v1507_v12  ;;  %1524 = vmatpush1.bf16.msra.mxu0 %v1523_v39  ;;  %v1104_v3 = vsel %vm243_vm7, %v1995_v62, %v1996_v16 }
 0x2f3   :  { %v1527_v19 = vpack.c.bf16 %v1103_v36, %v1089_v8  ;;  %v1113_v35 = vpop.permute.xlu0 %1112  ;;  %v1115_v42 = vpop.permute.xlu1 %1114  ;;  %1510 = vmatprep.subr.bf16.mxu1 %v1509_v28  ;;  %v1525_v25 = vpack.c.bf16 %v1104_v3, %v1090_v55 }
 0x2f4   :  { %v1118_v63 = vsel %vm272_vm8, %v1113_v35, %v1115_v42  ;;  %v1117_v31 = vsel %vm272_vm8, %v1111_v27, %v1113_v35 }
 0x2f5   :  { %1526 = vmatprep.subr.bf16.mxu0 %v1525_v25 }
 0x2f6   :  { %1512 = vmatpush1.bf16.msra.mxu1 %v1511_v57  ;;  %1528 = vmatpush1.bf16.msra.mxu0 %v1527_v19 }
 0x2f7   :  { %v999_v29 = vpop.permute.xlu0 %998  ;;  %1220 = vmatprep.subr.mxu1 %v1116_v1  ;;  %1291 = vmatprep.subr.mxu0 %v1118_v63 }
 0x2f8   :  { %v1002_v52 = vsel %vm272_vm8, %v2847_v4, %v999_v29 }
 0x2fa   :  { %1221 = vmatpush1.msra.mxu1 %v1002_v52  ;;  %1292 = vmatpush1.msra.mxu0 %v1117_v31 }
 0x2fb   :  { %1389 = vmatmul.mubr.msk.f32.vlgmr.msra.gmra.mrb[4].mxu1 %vm1129_vm13, %v2867_v17  ;;  %1390 = vmatmul.mubr.msk.f32.vlgmr.msra.gmra.mrb[4].mxu0 %vm1129_vm13, %v2867_v17 }
 0x304   :  { %v1127_v33 = vpop.permute.xlu1 %1126 }
 0x3aa   :  { %v1199_v2 = vpop.f32.mrb[2].mxu1 }
 0x3ab   :  { %v1201_v59 = vpop.f32.mrb[3].mxu1  ;;  %v1200_v4 = vadd.f32 %v1199_v2, %v1127_v33 }
 0x3ac   :  { %v1202_v41 = vadd.f32 %v1201_v59, %v1127_v33 }
 0x3ad   :  { %v1346_v14 = vmax.f32 %v1200_v4, 0.0 }
 0x3ae   :  { %v1347_v38 = vmax.f32 %v1202_v41, 0.0 }
 0x3ce   :  { %v1270_v51 = vpop.f32.mrb[4].mxu1  ;;  %v1341_v30 = vpop.f32.mrb[4].mxu0 }
 0x3cf   :  { %v1342_v34 = vadd.f32 %v1341_v30, %v1127_v33  ;;  %v1272_v48 = vpop.f32.mrb[5].mxu1  ;;  %v1343_v24 = vpop.f32.mrb[5].mxu0  ;;  %v1271_v54 = vadd.f32 %v1270_v51, %v1127_v33 }
 0x3d0   :  { %v1273_v46 = vadd.f32 %v1272_v48, %v1127_v33  ;;  %v1344_v9 = vadd.f32 %v1343_v24, %v1127_v33 }
 0x3d1   :  { %v1350_v18 = vmax.f32 %v1342_v34, 0.0  ;;  %v1348_v17 = vmax.f32 %v1271_v54, 0.0 }
 0x3d2   :  { %v1349_v44 = vmax.f32 %v1273_v46, 0.0  ;;  %v1351_v49 = vmax.f32 %v1344_v9, 0.0 }
 0x3d3   :  { %v1356_v32 = vrot.slane %v1350_v18, 4 }
 0x3d4   :  { %v1355_v60 = vrot.slane %v1349_v44, 4  ;;  %v1357_v40 = vrot.slane %v1351_v49, 4 }
 0x3d5   :  { %v1362_v10 = vsel %vm40_vm0, %v1347_v38, %v1356_v32 }
 0x3d6   :  { %1365 = vst [vmem:[%s2972_s6 + $0x8] sm:$0xff] %v1362_v10  ;;  %v1361_v50 = vsel %vm40_vm0, %v1346_v14, %v1355_v60  ;;  %v1363_v26 = vsel %vm40_vm0, %v1348_v17, %v1357_v40 }
 0x3d7   :  { %1364 = vst [vmem:[%s2972_s6] sm:$0xff] %v1361_v50  ;;  %1366 = vst [vmem:[%s2972_s6 + $0x10] sm:$0xff] %v1363_v26 }

</bundles_post_ra>
